<compile_context>
chip_gen: v7x
topology: tpu7x:2x2x1
jax: 0.10.0
libtpu: 0.0.40
codegen_flags: <defaults>
</compile_context>

<pallas_src>
import numpy as np
import jax
import jax.numpy as jnp
from jax import lax
from jax.experimental import pallas as pl
from jax.experimental.pallas import tpu as pltpu

MARGIN = 1.0   # ContrastiveLoss default margin
EPS = 1e-9     # ContrastiveLoss eps


def _round_up(x, m):
    return (x + m - 1) // m * m


def _make_kernel(num_rules, tiles_per_part, margin, eps):
    n_out = 1 + 2 * num_rules   # [ce_sum, ps_0..ps_{R-1}, pc_0..pc_{R-1}]

    def kernel(yh_ref, y_ref, pidx_ref, plab_ref, carry_ref, out_ref,
               ce_acc, ps_acc, pc_acc):
        p = pl.program_id(0)          # part (megacore "parallel" axis)
        j = pl.program_id(1)          # tile within the part ("arbitrary" reduction axis)

        @pl.when(j == 0)
        def _init():
            ce_acc[0] = jnp.float32(0.0)
            for r in range(num_rules):
                ps_acc[r] = jnp.float32(0.0)
                pc_acc[r] = jnp.float32(0.0)

        # ---- load + in-kernel lane-dense relayout (batch -> 128-lane axis) ----
        yh_nc = yh_ref[...].astype(jnp.float32)        # (TILE, C) native layout, no wrapper pad
        yh = jnp.transpose(yh_nc)                      # (C, TILE): XLU transpose, otherwise idle
        yl = y_ref[...]                                # (1, TILE) int32, -1 = batch padding / OOB lane
        c, tn = yh.shape
        tile_start = (p * tiles_per_part + j) * tn     # global element offset of this tile

        row_ok_b = yl >= 0
        # The trailing logits block may read past N (y_hat is not padded in the wrapper);
        # zero those lanes so lse / distances stay finite — their contributions are masked.
        yh = jnp.where(row_ok_b, yh, jnp.float32(0.0))
        row_ok = row_ok_b.astype(jnp.float32)

        # ---- nn.CrossEntropyLoss (sum over this tile; mean taken in the wrapper) ----
        row_max = jnp.max(yh, axis=0, keepdims=True)
        lse = jnp.log(jnp.sum(jnp.exp(yh - row_max), axis=0, keepdims=True)) + row_max
        cls_ids = lax.broadcasted_iota(jnp.int32, (c, tn), 0)
        onehot = (cls_ids == yl).astype(jnp.float32)
        picked = jnp.sum(yh * onehot, axis=0, keepdims=True)
        ce_acc[0] = ce_acc[0] + jnp.sum((lse - picked) * row_ok)

        # ---- per-rule ContrastiveLoss over consecutive masked pairs ----
        pidx_all = pidx_ref[...]                        # (R, TILE) int32: prev masked row, -1 = none
        plab_all = plab_ref[...]                        # (R, TILE) int32: its label, -1 = invalid pair
        carry_all = carry_ref[...].astype(jnp.float32)  # (1, C, R): cross-tile boundary rows

        # Fused one-hot predecessor gather for all rules in one MXU pass.
        # sel is exact 0/1 in bf16; casting yh to bf16 here is intentional (matches what the
        # default-precision f32 MXU path would do) and halves the TILE x (R*TILE) transient.
        local_prev = jnp.concatenate(
            [pidx_all[r:r + 1, :] for r in range(num_rules)], axis=1) - tile_start   # (1, R*TILE)
        src_ids = lax.broadcasted_iota(jnp.int32, (tn, num_rules * tn), 0)
        sel_all = (src_ids == local_prev).astype(jnp.bfloat16)                       # (TILE, R*TILE)
        a_prev_all = jnp.dot(yh.astype(jnp.bfloat16), sel_all,
                             preferred_element_type=jnp.float32)                     # (C, R*TILE)

        for r in range(num_rules):                      # static unroll, R is small
            pidx = pidx_all[r:r + 1, :]
            plab = plab_all[r:r + 1, :]
            valid = plab >= 0
            a_prev = a_prev_all[:, r * tn:(r + 1) * tn]           # (C, TILE)

            # Predecessor lives in an earlier tile -> use the precomputed boundary row.
            is_cross = valid & (pidx < tile_start)
            carry_col = carry_all[0, :, r:r + 1]                  # (C, 1)
            a_prev = jnp.where(is_cross, carry_col, a_prev)

            diff = yh - a_prev
            d = jnp.sum(diff * diff, axis=0, keepdims=True)       # (1, TILE) squared distance
            same = (plab == yl).astype(jnp.float32)               # class_flags (1 same / 0 diff)
            hinge = jnp.maximum(jnp.float32(margin) - jnp.sqrt(d + jnp.float32(eps)), 0.0)
            per_pair = 0.5 * (same * d + (1.0 - same) * hinge * hinge)
            vf = valid.astype(jnp.float32)
            ps_acc[r] = ps_acc[r] + jnp.sum(per_pair * vf)
            pc_acc[r] = pc_acc[r] + jnp.sum(vf)

        # ---- last tile of this part: emit partial sums (finalize divides in the wrapper) ----
        @pl.when(j == tiles_per_part - 1)
        def _write():
            lane = lax.broadcasted_iota(jnp.int32, (1, n_out), 1)
            out = jnp.where(lane == 0, ce_acc[0], jnp.float32(0.0))
            for r in range(num_rules):
                out = jnp.where(lane == 1 + r, ps_acc[r], out)
                out = jnp.where(lane == 1 + num_rules + r, pc_acc[r], out)
            out_ref[0] = out

    return kernel


def composite_loss(y_hat, y, rules, simi_factor, tile_n=512, num_parts=2):
    """y_hat: (N, C) float logits; y: (N,) int labels; rules: list of label tuples."""
    n, c = y_hat.shape
    num_rules = len(rules)
    assert num_rules >= 1, "CompositeLoss needs at least one rule"
    y = y.astype(jnp.int32)

    # Bigger tiles amortize the ~600-cycle per-grid-step cost; multi-tile lane widths must be
    # a multiple of 128, a single tile may be any width (block == full dim).
    tile = n if n <= tile_n else _round_up(tile_n, 128)
    n_tiles = pl.cdiv(n, tile)
    parts = max(1, min(num_parts, n_tiles))   # leading "parallel" axis (2 TensorCores on v7x)
    tpp = pl.cdiv(n_tiles, parts)             # tiles per part
    total_tiles = parts * tpp
    n_side = total_tiles * tile               # only the tiny int32 sidecar arrays are padded

    # Labels / predecessor sidecar (cheap XLA on int32 vectors).  y_hat itself is NOT padded
    # or transposed in the wrapper — the kernel streams it once in its native layout.
    y_p = jnp.pad(y, (0, n_side - n), constant_values=-1)   # -1 => excluded everywhere
    y2d = y_p[None, :]

    idx = jnp.arange(n_side, dtype=jnp.int32)
    prev_idx_rows, prev_lab_rows, carry_idx_rows = [], [], []
    for rule in rules:
        mask = jnp.zeros((n_side,), dtype=bool)
        for lab in rule:                       # target label included, as in the PyTorch code
            mask = mask | (y_p == lab)
        marked = jnp.where(mask, idx, jnp.int32(-1))
        cmax = lax.cummax(marked, axis=0)                          # last masked index <= j
        prev = jnp.concatenate([jnp.full((1,), -1, jnp.int32), cmax[:-1]])
        prev = jnp.where(mask, prev, jnp.int32(-1))                # only masked rows form pairs
        plab = jnp.where(prev >= 0, y_p[jnp.maximum(prev, 0)], jnp.int32(-1))
        prev_idx_rows.append(prev)
        prev_lab_rows.append(plab)
        if total_tiles > 1:
            boundary = cmax[tile - 1::tile][:total_tiles - 1]      # last masked idx before tile t
            carry_idx_rows.append(
                jnp.concatenate([jnp.full((1,), -1, jnp.int32), boundary]))
        else:
            carry_idx_rows.append(jnp.full((1,), -1, jnp.int32))

    prev_idx = jnp.stack(prev_idx_rows)        # (R, n_side) int32 — no sublane padding
    prev_lab = jnp.stack(prev_lab_rows)        # (R, n_side)
    carry_idx = jnp.stack(carry_idx_rows)      # (R, total_tiles)
    carry = y_hat[jnp.maximum(carry_idx, 0)]   # (R, total_tiles, C) — tiny gather, never read when -1
    carry = jnp.transpose(carry, (1, 2, 0))    # (total_tiles, C, R)

    n_out = 1 + 2 * num_rules
    kernel = _make_kernel(num_rules, tpp, MARGIN, EPS)

    def logits_map(p, j):
        # Fully padded tiles (beyond the last real one) re-read the last real block; every
        # lane of such a tile has label -1, so its contribution is masked to zero in-kernel.
        return (jnp.minimum(p * tpp + j, n_tiles - 1), 0)

    parts_out = pl.pallas_call(
        kernel,
        out_shape=jax.ShapeDtypeStruct((parts, 1, n_out), jnp.float32),
        grid_spec=pltpu.PrefetchScalarGridSpec(
            num_scalar_prefetch=0,
            grid=(parts, tpp),
            in_specs=[
                pl.BlockSpec((tile, c), logits_map),                               # logits (native)
                pl.BlockSpec((1, tile), lambda p, j: (0, p * tpp + j)),            # labels
                pl.BlockSpec((num_rules, tile), lambda p, j: (0, p * tpp + j)),    # prev masked index
                pl.BlockSpec((num_rules, tile), lambda p, j: (0, p * tpp + j)),    # prev masked label
                pl.BlockSpec((1, c, num_rules), lambda p, j: (p * tpp + j, 0, 0)), # carry rows
            ],
            out_specs=pl.BlockSpec((1, 1, n_out), lambda p, j: (p, 0, 0)),
            scratch_shapes=[
                pltpu.SMEM((1,), jnp.float32),           # CE sum accumulator
                pltpu.SMEM((num_rules,), jnp.float32),   # per-rule pair-loss sums
                pltpu.SMEM((num_rules,), jnp.float32),   # per-rule pair counts
            ],
        ),
        compiler_params=pltpu.CompilerParams(
            dimension_semantics=("parallel", "arbitrary"),
            vmem_limit_bytes=32 * 1024 * 1024,
        ),
    )(y_hat, y2d, prev_idx, prev_lab, carry)

    # Tiny finalize in the wrapper (O(R) scalar math): combine per-part partial sums.
    res = parts_out[:, 0, :]                               # (parts, 1 + 2R)
    ce = jnp.sum(res[:, 0]) / jnp.float32(n)
    simi = jnp.float32(0.0)
    for r in range(num_rules):
        ps = jnp.sum(res[:, 1 + r])
        cnt = jnp.sum(res[:, 1 + num_rules + r])           # == (#masked - 1) when #masked >= 1
        # ContrastiveLoss mean (/cnt) then CompositeLoss size_average (/cnt again);
        # clamp so cnt==0 (masked count 0 or 1) never produces NaN (documented divergence).
        denom = jnp.maximum(cnt * cnt, jnp.float32(1.0))
        simi = simi + jnp.where(cnt > 0.5, ps / denom, jnp.float32(0.0))
    return ce + jnp.float32(simi_factor) * simi


def numpy_reference(y_hat, y, rules, simi_factor, margin=MARGIN, eps=EPS):
    """Direct emulation of the PyTorch code (dynamic boolean masking), for verification."""
    y_hat = y_hat.astype(np.float64)
    shifted = y_hat - y_hat.max(1, keepdims=True)
    logp = shifted - np.log(np.exp(shifted).sum(1, keepdims=True))
    ce = -logp[np.arange(len(y)), y].mean()
    simi = 0.0
    for rule in rules:
        mask = np.isin(y, np.array(rule))
        if mask.sum() == 0:
            continue
        yh = y_hat[mask]
        yy = y[mask]
        if yh.shape[0] < 2:
            # PyTorch would produce nan here (mean of empty); both kernel & reference skip it.
            continue
        y1h, y2h = yh[:-1], yh[1:]
        t = (yy[:-1] == yy[1:]).astype(np.float64)
        d = ((y2h - y1h) ** 2).sum(1)
        losses = 0.5 * (t * d + (1.0 - t) * np.maximum(margin - np.sqrt(d + eps), 0.0) ** 2)
        loss = losses.mean()
        loss /= y1h.shape[0]              # size_average=True in CompositeLoss
        simi += loss
    return ce + simi_factor * simi


if __name__ == "__main__":
    key = jax.random.PRNGKey(0)
    k1, k2 = jax.random.split(key)
    N, C = 200, 10                        # batch=200, 10 classes
    y_hat = jax.random.normal(k1, (N, C), dtype=jnp.float32)
    y = jax.random.randint(k2, (N,), 0, C, dtype=jnp.int32)
    rules = [(0, 1, 2), (3, 4), (6, 7, 8)]   # each rule = (trigger..., target) class labels
    simi_factor = 0.5

    ref = numpy_reference(np.asarray(y_hat), np.asarray(y), rules, simi_factor)

    # Default config: single 200-wide tile, one part.
    out1 = jax.block_until_ready(composite_loss(y_hat, y, rules, simi_factor))
    # Forced multi-tile config: exercises cross-tile carry rows + the 2-part "parallel" split.
    out2 = jax.block_until_ready(composite_loss(y_hat, y, rules, simi_factor, tile_n=128))

    assert np.allclose(float(out1), ref, rtol=5e-4, atol=1e-4), (float(out1), ref)
    assert np.allclose(float(out2), ref, rtol=5e-4, atol=1e-4), (float(out2), ref)
    print("KERNEL_OK")
</pallas_src>

<mosaic_0001>
module attributes {stable_mosaic.version = 11 : i64} {
  func.func @kernel(%arg0: i32, %arg1: i32, %arg2: memref<200x10xf32, #tpu.memory_space<vmem>>, %arg3: memref<1x200xi32, #tpu.memory_space<vmem>>, %arg4: memref<3x200xi32, #tpu.memory_space<vmem>>, %arg5: memref<3x200xi32, #tpu.memory_space<vmem>>, %arg6: memref<1x10x3xf32, #tpu.memory_space<vmem>>, %arg7: memref<1x1x7xf32, #tpu.memory_space<vmem>>, %arg8: memref<1xf32, #tpu.memory_space<smem>>, %arg9: memref<3xf32, #tpu.memory_space<smem>>, %arg10: memref<3xf32, #tpu.memory_space<smem>>) attributes {dimension_semantics = [#tpu.dimension_semantics<parallel>, #tpu.dimension_semantics<arbitrary>], iteration_bounds = array<i64: 1, 1>, scalar_prefetch = 0 : i64, scratch_operands = 3 : i64, tpu.core_type = #tpu.core_type<tc>, window_params = [{transform_indices = @transform_0, window_bounds = array<i64: 200, 10>}, {transform_indices = @transform_1, window_bounds = array<i64: 1, 200>}, {transform_indices = @transform_2, window_bounds = array<i64: 3, 200>}, {transform_indices = @transform_3, window_bounds = array<i64: 3, 200>}, {transform_indices = @transform_4, window_bounds = array<i64: 1, 10, 3>}, {transform_indices = @transform_5, window_bounds = array<i64: 1, 1, 7>}]} {
    %c0_i32 = arith.constant 0 : i32
    %0 = arith.cmpi eq, %arg1, %c0_i32 : i32
    %1 = arith.extui %0 : i1 to i32
    %c0_i32_0 = arith.constant 0 : i32
    %2 = arith.cmpi ne, %1, %c0_i32_0 : i32
    scf.if %2 {
      %cst_58 = arith.constant 0.000000e+00 : f32
      %c0_59 = arith.constant 0 : index
      %225 = memref.load %arg8[%c0_59] : memref<1xf32, #tpu.memory_space<smem>>
      memref.store %cst_58, %arg8[%c0_59] : memref<1xf32, #tpu.memory_space<smem>>
      %cst_60 = arith.constant 0.000000e+00 : f32
      %c0_61 = arith.constant 0 : index
      %226 = memref.load %arg9[%c0_61] : memref<3xf32, #tpu.memory_space<smem>>
      memref.store %cst_60, %arg9[%c0_61] : memref<3xf32, #tpu.memory_space<smem>>
      %cst_62 = arith.constant 0.000000e+00 : f32
      %c0_63 = arith.constant 0 : index
      %227 = memref.load %arg10[%c0_63] : memref<3xf32, #tpu.memory_space<smem>>
      memref.store %cst_62, %arg10[%c0_63] : memref<3xf32, #tpu.memory_space<smem>>
      %cst_64 = arith.constant 0.000000e+00 : f32
      %c1_65 = arith.constant 1 : index
      %228 = memref.load %arg9[%c1_65] : memref<3xf32, #tpu.memory_space<smem>>
      memref.store %cst_64, %arg9[%c1_65] : memref<3xf32, #tpu.memory_space<smem>>
      %cst_66 = arith.constant 0.000000e+00 : f32
      %c1_67 = arith.constant 1 : index
      %229 = memref.load %arg10[%c1_67] : memref<3xf32, #tpu.memory_space<smem>>
      memref.store %cst_66, %arg10[%c1_67] : memref<3xf32, #tpu.memory_space<smem>>
      %cst_68 = arith.constant 0.000000e+00 : f32
      %c2_69 = arith.constant 2 : index
      %230 = memref.load %arg9[%c2_69] : memref<3xf32, #tpu.memory_space<smem>>
      memref.store %cst_68, %arg9[%c2_69] : memref<3xf32, #tpu.memory_space<smem>>
      %cst_70 = arith.constant 0.000000e+00 : f32
      %c2_71 = arith.constant 2 : index
      %231 = memref.load %arg10[%c2_71] : memref<3xf32, #tpu.memory_space<smem>>
      memref.store %cst_70, %arg10[%c2_71] : memref<3xf32, #tpu.memory_space<smem>>
    } else {
    }
    %c0 = arith.constant 0 : index
    %c0_1 = arith.constant 0 : index
    %3 = vector.load %arg2[%c0, %c0_1] : memref<200x10xf32, #tpu.memory_space<vmem>>, vector<200x10xf32>
    %4 = tpu.transpose %3, [1, 0] : vector<200x10xf32> -> vector<10x200xf32>
    %c0_2 = arith.constant 0 : index
    %c0_3 = arith.constant 0 : index
    %5 = vector.load %arg3[%c0_2, %c0_3] : memref<1x200xi32, #tpu.memory_space<vmem>>, vector<1x200xi32>
    %c1_i32 = arith.constant 1 : i32
    %6 = arith.muli %arg0, %c1_i32 : i32
    %7 = arith.addi %6, %arg1 : i32
    %c200_i32 = arith.constant 200 : i32
    %8 = arith.muli %7, %c200_i32 : i32
    %c0_i32_4 = arith.constant 0 : i32
    %9 = vector.broadcast %c0_i32_4 : i32 to vector<1x200xi32>
    %10 = arith.cmpi sge, %5, %9 : vector<1x200xi32>
    %cst = arith.constant 0.000000e+00 : f32
    %11 = vector.shape_cast %10 : vector<1x200xi1> to vector<1x200xi1>
    %12 = vector.broadcast %11 : vector<1x200xi1> to vector<10x200xi1>
    %13 = vector.broadcast %cst : f32 to vector<10x200xf32>
    %14 = arith.select %12, %4, %13 : vector<10x200xi1>, vector<10x200xf32>
    %15 = arith.extui %10 : vector<1x200xi1> to vector<1x200xi32>
    %16 = arith.sitofp %15 : vector<1x200xi32> to vector<1x200xf32>
    %cst_5 = arith.constant dense<0xFF800000> : vector<200xf32>
    %17 = vector.multi_reduction <maximumf>, %14, %cst_5 [0] : vector<10x200xf32> to vector<200xf32>
    %18 = vector.shape_cast %17 : vector<200xf32> to vector<1x200xf32>
    %19 = vector.broadcast %18 : vector<1x200xf32> to vector<10x200xf32>
    %20 = arith.subf %14, %19 : vector<10x200xf32>
    %21 = math.exp %20 : vector<10x200xf32>
    %cst_6 = arith.constant dense<0.000000e+00> : vector<200xf32>
    %22 = vector.multi_reduction <add>, %21, %cst_6 [0] : vector<10x200xf32> to vector<200xf32>
    %23 = vector.shape_cast %22 : vector<200xf32> to vector<1x200xf32>
    %24 = math.log %23 : vector<1x200xf32>
    %25 = arith.addf %24, %18 : vector<1x200xf32>
    %26 = tpu.iota {dimensions = array<i32: 0>} : vector<10x200xi32>
    %27 = vector.broadcast %5 : vector<1x200xi32> to vector<10x200xi32>
    %28 = arith.cmpi eq, %26, %27 : vector<10x200xi32>
    %29 = arith.extui %28 : vector<10x200xi1> to vector<10x200xi32>
    %30 = arith.sitofp %29 : vector<10x200xi32> to vector<10x200xf32>
    %31 = arith.mulf %14, %30 : vector<10x200xf32>
    %cst_7 = arith.constant dense<0.000000e+00> : vector<200xf32>
    %32 = vector.multi_reduction <add>, %31, %cst_7 [0] : vector<10x200xf32> to vector<200xf32>
    %33 = vector.shape_cast %32 : vector<200xf32> to vector<1x200xf32>
    %c0_8 = arith.constant 0 : index
    %34 = memref.load %arg8[%c0_8] : memref<1xf32, #tpu.memory_space<smem>>
    %35 = arith.subf %25, %33 : vector<1x200xf32>
    %36 = arith.mulf %35, %16 : vector<1x200xf32>
    %37 = vector.shape_cast %36 : vector<1x200xf32> to vector<1x1x200xf32>
    %cst_9 = arith.constant dense<0.000000e+00> : vector<1xf32>
    %38 = vector.multi_reduction <add>, %37, %cst_9 [1, 2] : vector<1x1x200xf32> to vector<1xf32>
    %39 = vector.shape_cast %38 : vector<1xf32> to vector<1x1x1xf32>
    %40 = vector.extract %39[0, 0, 0] : f32 from vector<1x1x1xf32>
    %41 = arith.addf %34, %40 : f32
    %c0_10 = arith.constant 0 : index
    %42 = memref.load %arg8[%c0_10] : memref<1xf32, #tpu.memory_space<smem>>
    memref.store %41, %arg8[%c0_10] : memref<1xf32, #tpu.memory_space<smem>>
    %c0_11 = arith.constant 0 : index
    %c0_12 = arith.constant 0 : index
    %43 = vector.load %arg4[%c0_11, %c0_12] : memref<3x200xi32, #tpu.memory_space<vmem>>, vector<3x200xi32>
    %c0_13 = arith.constant 0 : index
    %c0_14 = arith.constant 0 : index
    %44 = vector.load %arg5[%c0_13, %c0_14] : memref<3x200xi32, #tpu.memory_space<vmem>>, vector<3x200xi32>
    %c0_15 = arith.constant 0 : index
    %c0_16 = arith.constant 0 : index
    %c0_17 = arith.constant 0 : index
    %45 = vector.load %arg6[%c0_15, %c0_16, %c0_17] : memref<1x10x3xf32, #tpu.memory_space<vmem>>, vector<1x10x3xf32>
    %46 = vector.extract_strided_slice %43 {offsets = [0, 0], sizes = [1, 200], strides = [1, 1]} : vector<3x200xi32> to vector<1x200xi32>
    %47 = vector.extract_strided_slice %43 {offsets = [1, 0], sizes = [1, 200], strides = [1, 1]} : vector<3x200xi32> to vector<1x200xi32>
    %48 = vector.extract_strided_slice %43 {offsets = [2, 0], sizes = [1, 200], strides = [1, 1]} : vector<3x200xi32> to vector<1x200xi32>
    %49 = tpu.concatenate %46, %47, %48 in 1 : vector<1x200xi32>, vector<1x200xi32>, vector<1x200xi32> -> vector<1x600xi32>
    %50 = vector.broadcast %8 : i32 to vector<1x600xi32>
    %51 = arith.subi %49, %50 : vector<1x600xi32>
    %52 = tpu.iota {dimensions = array<i32: 0>} : vector<200x600xi32>
    %53 = vector.broadcast %51 : vector<1x600xi32> to vector<200x600xi32>
    %54 = arith.cmpi eq, %52, %53 : vector<200x600xi32>
    %55 = arith.extui %54 : vector<200x600xi1> to vector<200x600xi32>
    %56 = arith.sitofp %55 : vector<200x600xi32> to vector<200x600xf32>
    %57 = arith.truncf %56 : vector<200x600xf32> to vector<200x600xbf16>
    %58 = arith.truncf %14 : vector<10x200xf32> to vector<10x200xbf16>
    %cst_18 = arith.constant dense<0.000000e+00> : vector<10x600xf32>
    %59 = tpu.matmul %58, %57, %cst_18 {dimension_numbers = #tpu.dot_dimension_numbers<[1], [0], [0], [1], [0, 0, 1, 1], [], []>} : vector<10x200xbf16>, vector<200x600xbf16>, vector<10x600xf32> -> vector<10x600xf32>
    %60 = vector.extract_strided_slice %43 {offsets = [0, 0], sizes = [1, 200], strides = [1, 1]} : vector<3x200xi32> to vector<1x200xi32>
    %61 = vector.extract_strided_slice %44 {offsets = [0, 0], sizes = [1, 200], strides = [1, 1]} : vector<3x200xi32> to vector<1x200xi32>
    %c0_i32_19 = arith.constant 0 : i32
    %62 = vector.broadcast %c0_i32_19 : i32 to vector<1x200xi32>
    %63 = arith.cmpi sge, %61, %62 : vector<1x200xi32>
    %64 = vector.extract_strided_slice %59 {offsets = [0, 0], sizes = [10, 200], strides = [1, 1]} : vector<10x600xf32> to vector<10x200xf32>
    %65 = vector.broadcast %8 : i32 to vector<1x200xi32>
    %66 = arith.cmpi slt, %60, %65 : vector<1x200xi32>
    %67 = arith.andi %63, %66 : vector<1x200xi1>
    %68 = vector.extract_strided_slice %45 {offsets = [0, 0, 0], sizes = [1, 10, 1], strides = [1, 1, 1]} : vector<1x10x3xf32> to vector<1x10x1xf32>
    %69 = vector.shape_cast %68 : vector<1x10x1xf32> to vector<10x1xf32>
    %70 = vector.shape_cast %67 : vector<1x200xi1> to vector<1x200xi1>
    %71 = vector.broadcast %70 : vector<1x200xi1> to vector<10x200xi1>
    %72 = vector.shape_cast %69 : vector<10x1xf32> to vector<10x1xf32>
    %73 = vector.broadcast %72 : vector<10x1xf32> to vector<10x200xf32>
    %74 = arith.select %71, %73, %64 : vector<10x200xi1>, vector<10x200xf32>
    %75 = arith.subf %14, %74 : vector<10x200xf32>
    %76 = arith.mulf %75, %75 : vector<10x200xf32>
    %cst_20 = arith.constant dense<0.000000e+00> : vector<200xf32>
    %77 = vector.multi_reduction <add>, %76, %cst_20 [0] : vector<10x200xf32> to vector<200xf32>
    %78 = vector.shape_cast %77 : vector<200xf32> to vector<1x200xf32>
    %79 = arith.cmpi eq, %61, %5 : vector<1x200xi32>
    %80 = arith.extui %79 : vector<1x200xi1> to vector<1x200xi32>
    %81 = arith.sitofp %80 : vector<1x200xi32> to vector<1x200xf32>
    %cst_21 = arith.constant 9.99999971E-10 : f32
    %82 = vector.broadcast %cst_21 : f32 to vector<1x200xf32>
    %83 = arith.addf %78, %82 : vector<1x200xf32>
    %84 = math.sqrt %83 : vector<1x200xf32>
    %cst_22 = arith.constant 1.000000e+00 : f32
    %85 = vector.broadcast %cst_22 : f32 to vector<1x200xf32>
    %86 = arith.subf %85, %84 : vector<1x200xf32>
    %cst_23 = arith.constant 0.000000e+00 : f32
    %87 = vector.broadcast %cst_23 : f32 to vector<1x200xf32>
    %88 = arith.maximumf %86, %87 : vector<1x200xf32>
    %89 = arith.mulf %81, %78 : vector<1x200xf32>
    %cst_24 = arith.constant 1.000000e+00 : f32
    %90 = vector.broadcast %cst_24 : f32 to vector<1x200xf32>
    %91 = arith.subf %90, %81 : vector<1x200xf32>
    %92 = arith.mulf %91, %88 : vector<1x200xf32>
    %93 = arith.mulf %92, %88 : vector<1x200xf32>
    %94 = arith.addf %89, %93 : vector<1x200xf32>
    %cst_25 = arith.constant 5.000000e-01 : f32
    %95 = vector.broadcast %cst_25 : f32 to vector<1x200xf32>
    %96 = arith.mulf %95, %94 : vector<1x200xf32>
    %97 = arith.extui %63 : vector<1x200xi1> to vector<1x200xi32>
    %98 = arith.sitofp %97 : vector<1x200xi32> to vector<1x200xf32>
    %c0_26 = arith.constant 0 : index
    %99 = memref.load %arg9[%c0_26] : memref<3xf32, #tpu.memory_space<smem>>
    %100 = arith.mulf %96, %98 : vector<1x200xf32>
    %101 = vector.shape_cast %100 : vector<1x200xf32> to vector<1x1x200xf32>
    %cst_27 = arith.constant dense<0.000000e+00> : vector<1xf32>
    %102 = vector.multi_reduction <add>, %101, %cst_27 [1, 2] : vector<1x1x200xf32> to vector<1xf32>
    %103 = vector.shape_cast %102 : vector<1xf32> to vector<1x1x1xf32>
    %104 = vector.extract %103[0, 0, 0] : f32 from vector<1x1x1xf32>
    %105 = arith.addf %99, %104 : f32
    %c0_28 = arith.constant 0 : index
    %106 = memref.load %arg9[%c0_28] : memref<3xf32, #tpu.memory_space<smem>>
    memref.store %105, %arg9[%c0_28] : memref<3xf32, #tpu.memory_space<smem>>
    %c0_29 = arith.constant 0 : index
    %107 = memref.load %arg10[%c0_29] : memref<3xf32, #tpu.memory_space<smem>>
    %108 = vector.shape_cast %98 : vector<1x200xf32> to vector<1x1x200xf32>
    %cst_30 = arith.constant dense<0.000000e+00> : vector<1xf32>
    %109 = vector.multi_reduction <add>, %108, %cst_30 [1, 2] : vector<1x1x200xf32> to vector<1xf32>
    %110 = vector.shape_cast %109 : vector<1xf32> to vector<1x1x1xf32>
    %111 = vector.extract %110[0, 0, 0] : f32 from vector<1x1x1xf32>
    %112 = arith.addf %107, %111 : f32
    %c0_31 = arith.constant 0 : index
    %113 = memref.load %arg10[%c0_31] : memref<3xf32, #tpu.memory_space<smem>>
    memref.store %112, %arg10[%c0_31] : memref<3xf32, #tpu.memory_space<smem>>
    %114 = vector.extract_strided_slice %43 {offsets = [1, 0], sizes = [1, 200], strides = [1, 1]} : vector<3x200xi32> to vector<1x200xi32>
    %115 = vector.extract_strided_slice %44 {offsets = [1, 0], sizes = [1, 200], strides = [1, 1]} : vector<3x200xi32> to vector<1x200xi32>
    %c0_i32_32 = arith.constant 0 : i32
    %116 = vector.broadcast %c0_i32_32 : i32 to vector<1x200xi32>
    %117 = arith.cmpi sge, %115, %116 : vector<1x200xi32>
    %118 = vector.extract_strided_slice %59 {offsets = [0, 200], sizes = [10, 200], strides = [1, 1]} : vector<10x600xf32> to vector<10x200xf32>
    %119 = vector.broadcast %8 : i32 to vector<1x200xi32>
    %120 = arith.cmpi slt, %114, %119 : vector<1x200xi32>
    %121 = arith.andi %117, %120 : vector<1x200xi1>
    %122 = vector.extract_strided_slice %45 {offsets = [0, 0, 1], sizes = [1, 10, 1], strides = [1, 1, 1]} : vector<1x10x3xf32> to vector<1x10x1xf32>
    %123 = vector.shape_cast %122 : vector<1x10x1xf32> to vector<10x1xf32>
    %124 = vector.shape_cast %121 : vector<1x200xi1> to vector<1x200xi1>
    %125 = vector.broadcast %124 : vector<1x200xi1> to vector<10x200xi1>
    %126 = vector.shape_cast %123 : vector<10x1xf32> to vector<10x1xf32>
    %127 = vector.broadcast %126 : vector<10x1xf32> to vector<10x200xf32>
    %128 = arith.select %125, %127, %118 : vector<10x200xi1>, vector<10x200xf32>
    %129 = arith.subf %14, %128 : vector<10x200xf32>
    %130 = arith.mulf %129, %129 : vector<10x200xf32>
    %cst_33 = arith.constant dense<0.000000e+00> : vector<200xf32>
    %131 = vector.multi_reduction <add>, %130, %cst_33 [0] : vector<10x200xf32> to vector<200xf32>
    %132 = vector.shape_cast %131 : vector<200xf32> to vector<1x200xf32>
    %133 = arith.cmpi eq, %115, %5 : vector<1x200xi32>
    %134 = arith.extui %133 : vector<1x200xi1> to vector<1x200xi32>
    %135 = arith.sitofp %134 : vector<1x200xi32> to vector<1x200xf32>
    %cst_34 = arith.constant 9.99999971E-10 : f32
    %136 = vector.broadcast %cst_34 : f32 to vector<1x200xf32>
    %137 = arith.addf %132, %136 : vector<1x200xf32>
    %138 = math.sqrt %137 : vector<1x200xf32>
    %cst_35 = arith.constant 1.000000e+00 : f32
    %139 = vector.broadcast %cst_35 : f32 to vector<1x200xf32>
    %140 = arith.subf %139, %138 : vector<1x200xf32>
    %cst_36 = arith.constant 0.000000e+00 : f32
    %141 = vector.broadcast %cst_36 : f32 to vector<1x200xf32>
    %142 = arith.maximumf %140, %141 : vector<1x200xf32>
    %143 = arith.mulf %135, %132 : vector<1x200xf32>
    %cst_37 = arith.constant 1.000000e+00 : f32
    %144 = vector.broadcast %cst_37 : f32 to vector<1x200xf32>
    %145 = arith.subf %144, %135 : vector<1x200xf32>
    %146 = arith.mulf %145, %142 : vector<1x200xf32>
    %147 = arith.mulf %146, %142 : vector<1x200xf32>
    %148 = arith.addf %143, %147 : vector<1x200xf32>
    %cst_38 = arith.constant 5.000000e-01 : f32
    %149 = vector.broadcast %cst_38 : f32 to vector<1x200xf32>
    %150 = arith.mulf %149, %148 : vector<1x200xf32>
    %151 = arith.extui %117 : vector<1x200xi1> to vector<1x200xi32>
    %152 = arith.sitofp %151 : vector<1x200xi32> to vector<1x200xf32>
    %c1 = arith.constant 1 : index
    %153 = memref.load %arg9[%c1] : memref<3xf32, #tpu.memory_space<smem>>
    %154 = arith.mulf %150, %152 : vector<1x200xf32>
    %155 = vector.shape_cast %154 : vector<1x200xf32> to vector<1x1x200xf32>
    %cst_39 = arith.constant dense<0.000000e+00> : vector<1xf32>
    %156 = vector.multi_reduction <add>, %155, %cst_39 [1, 2] : vector<1x1x200xf32> to vector<1xf32>
    %157 = vector.shape_cast %156 : vector<1xf32> to vector<1x1x1xf32>
    %158 = vector.extract %157[0, 0, 0] : f32 from vector<1x1x1xf32>
    %159 = arith.addf %153, %158 : f32
    %c1_40 = arith.constant 1 : index
    %160 = memref.load %arg9[%c1_40] : memref<3xf32, #tpu.memory_space<smem>>
    memref.store %159, %arg9[%c1_40] : memref<3xf32, #tpu.memory_space<smem>>
    %c1_41 = arith.constant 1 : index
    %161 = memref.load %arg10[%c1_41] : memref<3xf32, #tpu.memory_space<smem>>
    %162 = vector.shape_cast %152 : vector<1x200xf32> to vector<1x1x200xf32>
    %cst_42 = arith.constant dense<0.000000e+00> : vector<1xf32>
    %163 = vector.multi_reduction <add>, %162, %cst_42 [1, 2] : vector<1x1x200xf32> to vector<1xf32>
    %164 = vector.shape_cast %163 : vector<1xf32> to vector<1x1x1xf32>
    %165 = vector.extract %164[0, 0, 0] : f32 from vector<1x1x1xf32>
    %166 = arith.addf %161, %165 : f32
    %c1_43 = arith.constant 1 : index
    %167 = memref.load %arg10[%c1_43] : memref<3xf32, #tpu.memory_space<smem>>
    memref.store %166, %arg10[%c1_43] : memref<3xf32, #tpu.memory_space<smem>>
    %168 = vector.extract_strided_slice %43 {offsets = [2, 0], sizes = [1, 200], strides = [1, 1]} : vector<3x200xi32> to vector<1x200xi32>
    %169 = vector.extract_strided_slice %44 {offsets = [2, 0], sizes = [1, 200], strides = [1, 1]} : vector<3x200xi32> to vector<1x200xi32>
    %c0_i32_44 = arith.constant 0 : i32
    %170 = vector.broadcast %c0_i32_44 : i32 to vector<1x200xi32>
    %171 = arith.cmpi sge, %169, %170 : vector<1x200xi32>
    %172 = vector.extract_strided_slice %59 {offsets = [0, 400], sizes = [10, 200], strides = [1, 1]} : vector<10x600xf32> to vector<10x200xf32>
    %173 = vector.broadcast %8 : i32 to vector<1x200xi32>
    %174 = arith.cmpi slt, %168, %173 : vector<1x200xi32>
    %175 = arith.andi %171, %174 : vector<1x200xi1>
    %176 = vector.extract_strided_slice %45 {offsets = [0, 0, 2], sizes = [1, 10, 1], strides = [1, 1, 1]} : vector<1x10x3xf32> to vector<1x10x1xf32>
    %177 = vector.shape_cast %176 : vector<1x10x1xf32> to vector<10x1xf32>
    %178 = vector.shape_cast %175 : vector<1x200xi1> to vector<1x200xi1>
    %179 = vector.broadcast %178 : vector<1x200xi1> to vector<10x200xi1>
    %180 = vector.shape_cast %177 : vector<10x1xf32> to vector<10x1xf32>
    %181 = vector.broadcast %180 : vector<10x1xf32> to vector<10x200xf32>
    %182 = arith.select %179, %181, %172 : vector<10x200xi1>, vector<10x200xf32>
    %183 = arith.subf %14, %182 : vector<10x200xf32>
    %184 = arith.mulf %183, %183 : vector<10x200xf32>
    %cst_45 = arith.constant dense<0.000000e+00> : vector<200xf32>
    %185 = vector.multi_reduction <add>, %184, %cst_45 [0] : vector<10x200xf32> to vector<200xf32>
    %186 = vector.shape_cast %185 : vector<200xf32> to vector<1x200xf32>
    %187 = arith.cmpi eq, %169, %5 : vector<1x200xi32>
    %188 = arith.extui %187 : vector<1x200xi1> to vector<1x200xi32>
    %189 = arith.sitofp %188 : vector<1x200xi32> to vector<1x200xf32>
    %cst_46 = arith.constant 9.99999971E-10 : f32
    %190 = vector.broadcast %cst_46 : f32 to vector<1x200xf32>
    %191 = arith.addf %186, %190 : vector<1x200xf32>
    %192 = math.sqrt %191 : vector<1x200xf32>
    %cst_47 = arith.constant 1.000000e+00 : f32
    %193 = vector.broadcast %cst_47 : f32 to vector<1x200xf32>
    %194 = arith.subf %193, %192 : vector<1x200xf32>
    %cst_48 = arith.constant 0.000000e+00 : f32
    %195 = vector.broadcast %cst_48 : f32 to vector<1x200xf32>
    %196 = arith.maximumf %194, %195 : vector<1x200xf32>
    %197 = arith.mulf %189, %186 : vector<1x200xf32>
    %cst_49 = arith.constant 1.000000e+00 : f32
    %198 = vector.broadcast %cst_49 : f32 to vector<1x200xf32>
    %199 = arith.subf %198, %189 : vector<1x200xf32>
    %200 = arith.mulf %199, %196 : vector<1x200xf32>
    %201 = arith.mulf %200, %196 : vector<1x200xf32>
    %202 = arith.addf %197, %201 : vector<1x200xf32>
    %cst_50 = arith.constant 5.000000e-01 : f32
    %203 = vector.broadcast %cst_50 : f32 to vector<1x200xf32>
    %204 = arith.mulf %203, %202 : vector<1x200xf32>
    %205 = arith.extui %171 : vector<1x200xi1> to vector<1x200xi32>
    %206 = arith.sitofp %205 : vector<1x200xi32> to vector<1x200xf32>
    %c2 = arith.constant 2 : index
    %207 = memref.load %arg9[%c2] : memref<3xf32, #tpu.memory_space<smem>>
    %208 = arith.mulf %204, %206 : vector<1x200xf32>
    %209 = vector.shape_cast %208 : vector<1x200xf32> to vector<1x1x200xf32>
    %cst_51 = arith.constant dense<0.000000e+00> : vector<1xf32>
    %210 = vector.multi_reduction <add>, %209, %cst_51 [1, 2] : vector<1x1x200xf32> to vector<1xf32>
    %211 = vector.shape_cast %210 : vector<1xf32> to vector<1x1x1xf32>
    %212 = vector.extract %211[0, 0, 0] : f32 from vector<1x1x1xf32>
    %213 = arith.addf %207, %212 : f32
    %c2_52 = arith.constant 2 : index
    %214 = memref.load %arg9[%c2_52] : memref<3xf32, #tpu.memory_space<smem>>
    memref.store %213, %arg9[%c2_52] : memref<3xf32, #tpu.memory_space<smem>>
    %c2_53 = arith.constant 2 : index
    %215 = memref.load %arg10[%c2_53] : memref<3xf32, #tpu.memory_space<smem>>
    %216 = vector.shape_cast %206 : vector<1x200xf32> to vector<1x1x200xf32>
    %cst_54 = arith.constant dense<0.000000e+00> : vector<1xf32>
    %217 = vector.multi_reduction <add>, %216, %cst_54 [1, 2] : vector<1x1x200xf32> to vector<1xf32>
    %218 = vector.shape_cast %217 : vector<1xf32> to vector<1x1x1xf32>
    %219 = vector.extract %218[0, 0, 0] : f32 from vector<1x1x1xf32>
    %220 = arith.addf %215, %219 : f32
    %c2_55 = arith.constant 2 : index
    %221 = memref.load %arg10[%c2_55] : memref<3xf32, #tpu.memory_space<smem>>
    memref.store %220, %arg10[%c2_55] : memref<3xf32, #tpu.memory_space<smem>>
    %c0_i32_56 = arith.constant 0 : i32
    %222 = arith.cmpi eq, %arg1, %c0_i32_56 : i32
    %223 = arith.extui %222 : i1 to i32
    %c0_i32_57 = arith.constant 0 : i32
    %224 = arith.cmpi ne, %223, %c0_i32_57 : i32
    scf.if %224 {
      %225 = tpu.iota {dimensions = array<i32: 1>} : vector<1x7xi32>
      %c0_i32_58 = arith.constant 0 : i32
      %226 = vector.broadcast %c0_i32_58 : i32 to vector<1x7xi32>
      %227 = arith.cmpi eq, %225, %226 : vector<1x7xi32>
      %c0_59 = arith.constant 0 : index
      %228 = memref.load %arg8[%c0_59] : memref<1xf32, #tpu.memory_space<smem>>
      %cst_60 = arith.constant 0.000000e+00 : f32
      %229 = vector.broadcast %228 : f32 to vector<1x7xf32>
      %230 = vector.broadcast %cst_60 : f32 to vector<1x7xf32>
      %231 = arith.select %227, %229, %230 : vector<1x7xi1>, vector<1x7xf32>
      %c1_i32_61 = arith.constant 1 : i32
      %232 = vector.broadcast %c1_i32_61 : i32 to vector<1x7xi32>
      %233 = arith.cmpi eq, %225, %232 : vector<1x7xi32>
      %c0_62 = arith.constant 0 : index
      %234 = memref.load %arg9[%c0_62] : memref<3xf32, #tpu.memory_space<smem>>
      %235 = vector.broadcast %234 : f32 to vector<1x7xf32>
      %236 = arith.select %233, %235, %231 : vector<1x7xi1>, vector<1x7xf32>
      %c4_i32 = arith.constant 4 : i32
      %237 = vector.broadcast %c4_i32 : i32 to vector<1x7xi32>
      %238 = arith.cmpi eq, %225, %237 : vector<1x7xi32>
      %c0_63 = arith.constant 0 : index
      %239 = memref.load %arg10[%c0_63] : memref<3xf32, #tpu.memory_space<smem>>
      %240 = vector.broadcast %239 : f32 to vector<1x7xf32>
      %241 = arith.select %238, %240, %236 : vector<1x7xi1>, vector<1x7xf32>
      %c2_i32 = arith.constant 2 : i32
      %242 = vector.broadcast %c2_i32 : i32 to vector<1x7xi32>
      %243 = arith.cmpi eq, %225, %242 : vector<1x7xi32>
      %c1_64 = arith.constant 1 : index
      %244 = memref.load %arg9[%c1_64] : memref<3xf32, #tpu.memory_space<smem>>
      %245 = vector.broadcast %244 : f32 to vector<1x7xf32>
      %246 = arith.select %243, %245, %241 : vector<1x7xi1>, vector<1x7xf32>
      %c5_i32 = arith.constant 5 : i32
      %247 = vector.broadcast %c5_i32 : i32 to vector<1x7xi32>
      %248 = arith.cmpi eq, %225, %247 : vector<1x7xi32>
      %c1_65 = arith.constant 1 : index
      %249 = memref.load %arg10[%c1_65] : memref<3xf32, #tpu.memory_space<smem>>
      %250 = vector.broadcast %249 : f32 to vector<1x7xf32>
      %251 = arith.select %248, %250, %246 : vector<1x7xi1>, vector<1x7xf32>
      %c3_i32 = arith.constant 3 : i32
      %252 = vector.broadcast %c3_i32 : i32 to vector<1x7xi32>
      %253 = arith.cmpi eq, %225, %252 : vector<1x7xi32>
      %c2_66 = arith.constant 2 : index
      %254 = memref.load %arg9[%c2_66] : memref<3xf32, #tpu.memory_space<smem>>
      %255 = vector.broadcast %254 : f32 to vector<1x7xf32>
      %256 = arith.select %253, %255, %251 : vector<1x7xi1>, vector<1x7xf32>
      %c6_i32 = arith.constant 6 : i32
      %257 = vector.broadcast %c6_i32 : i32 to vector<1x7xi32>
      %258 = arith.cmpi eq, %225, %257 : vector<1x7xi32>
      %c2_67 = arith.constant 2 : index
      %259 = memref.load %arg10[%c2_67] : memref<3xf32, #tpu.memory_space<smem>>
      %260 = vector.broadcast %259 : f32 to vector<1x7xf32>
      %261 = arith.select %258, %260, %256 : vector<1x7xi1>, vector<1x7xf32>
      %c0_68 = arith.constant 0 : index
      %c0_69 = arith.constant 0 : index
      %c0_70 = arith.constant 0 : index
      %262 = vector.load %arg7[%c0_68, %c0_69, %c0_70] : memref<1x1x7xf32, #tpu.memory_space<vmem>>, vector<1x1x7xf32>
      %263 = vector.shape_cast %262 : vector<1x1x7xf32> to vector<1x7xf32>
      %264 = vector.shape_cast %261 : vector<1x7xf32> to vector<1x1x7xf32>
      tpu.vector_store %arg7[%c0_68, %c0_69, %c0_70], %264 {strides = array<i32>} : memref<1x1x7xf32, #tpu.memory_space<vmem>>, vector<1x1x7xf32>,
    } else {
    }
    return
  }
  func.func @transform_0(%arg0: i32, %arg1: i32) -> (i32, i32) {
    %c1_i32 = arith.constant 1 : i32
    %0 = arith.muli %arg0, %c1_i32 : i32
    %1 = arith.addi %0, %arg1 : i32
    %c0_i32 = arith.constant 0 : i32
    %2 = arith.minsi %1, %c0_i32 : i32
    %c0_i32_0 = arith.constant 0 : i32
    %c0_i32_1 = arith.constant 0 : i32
    return %2, %c0_i32_0 : i32, i32
  }
  func.func @transform_1(%arg0: i32, %arg1: i32) -> (i32, i32) {
    %c1_i32 = arith.constant 1 : i32
    %0 = arith.muli %arg0, %c1_i32 : i32
    %1 = arith.addi %0, %arg1 : i32
    %c0_i32 = arith.constant 0 : i32
    %c0_i32_0 = arith.constant 0 : i32
    return %c0_i32, %1 : i32, i32
  }
  func.func @transform_2(%arg0: i32, %arg1: i32) -> (i32, i32) {
    %c1_i32 = arith.constant 1 : i32
    %0 = arith.muli %arg0, %c1_i32 : i32
    %1 = arith.addi %0, %arg1 : i32
    %c0_i32 = arith.constant 0 : i32
    %c0_i32_0 = arith.constant 0 : i32
    return %c0_i32, %1 : i32, i32
  }
  func.func @transform_3(%arg0: i32, %arg1: i32) -> (i32, i32) {
    %c1_i32 = arith.constant 1 : i32
    %0 = arith.muli %arg0, %c1_i32 : i32
    %1 = arith.addi %0, %arg1 : i32
    %c0_i32 = arith.constant 0 : i32
    %c0_i32_0 = arith.constant 0 : i32
    return %c0_i32, %1 : i32, i32
  }
  func.func @transform_4(%arg0: i32, %arg1: i32) -> (i32, i32, i32) {
    %c1_i32 = arith.constant 1 : i32
    %0 = arith.muli %arg0, %c1_i32 : i32
    %1 = arith.addi %0, %arg1 : i32
    %c0_i32 = arith.constant 0 : i32
    %c0_i32_0 = arith.constant 0 : i32
    %c0_i32_1 = arith.constant 0 : i32
    return %1, %c0_i32, %c0_i32_0 : i32, i32, i32
  }
  func.func @transform_5(%arg0: i32, %arg1: i32) -> (i32, i32, i32) {
    %c0_i32 = arith.constant 0 : i32
    %c0_i32_0 = arith.constant 0 : i32
    %c0_i32_1 = arith.constant 0 : i32
    return %arg0, %c0_i32, %c0_i32_0 : i32, i32, i32
  }
}

</mosaic_0001>

<bundles_post_ra>
// kernel: tpu_custom_call.1
= control target key start
LH: loop header
LB: loop body
LE: loop exit
PB: predicated region body
PF: predicated region fallthrough
CT: control target
= control target key end

     0   :  { %v249_v0 = vlaneseq  ;;  %s1996_s20 = smov 16   ;;  %s1997_s21 = smov 72   ;;  %s3322_s0 = inlined_call_operand.vmem [shape: f32[200,10], index: 0, kind: input, shape index: {}]   ;;  %s3323_s1 = inlined_call_operand.vmem [shape: s32[1,200], index: 1, kind: input, shape index: {}]   ;;  %s3324_s2 = inlined_call_operand.vmem [shape: s32[3,200], index: 2, kind: input, shape index: {}]   ;;  %s3325_s3 = inlined_call_operand.vmem [shape: s32[3,200], index: 3, kind: input, shape index: {}]   ;;  %s3326_s4 = inlined_call_operand.vmem [shape: f32[1,10,3], index: 4, kind: input, shape index: {}]   ;;  %s3327_s5 = inlined_call_operand.hbm [shape: f32[1,1,7], index: 5, kind: output, shape index: {}]  }
   0x1   :  { %v2043_v2 = vld [vmem:[%s3324_s2] sm:$0x77] }
   0x2   :  { %v2038_v1 = vshrl.u32 %v249_v0, 7 }
   0x4   :  { %v2046_v3 = vsub.s32 2, %v2038_v1  ;;  %v2049_v4 = vsub.s32 1, %v2038_v1  ;;  %v2052_v5 = vsub.s32 6, %v2038_v1  ;;  %v2055_v6 = vsub.s32 5, %v2038_v1 }
   0x6   :  { %v424_v7 = vrot.slane %v2043_v2, %v2046_v3  ;;  %v411_v8 = vrot.slane %v2043_v2, %v2049_v4  ;;  %v428_v9 = vrot.slane %v2043_v2, %v2052_v5  ;;  %v415_v10 = vrot.slane %v2043_v2, %v2055_v6 }
   0x8   :  { %429 = vrot.lane.b32.xlu1 %v424_v7, %s1996_s20  ;;  %416 = vrot.lane.b32.xlu0 %v411_v8, %s1997_s21 }
   0x9   :  { %10 = vsyncpa [#allocation6], 0  ;;  %v171_v11 = vld [vmem:[%s3322_s0 + $0x80] sm:$0xff]  ;;  %v172_v12 = vld [vmem:[%s3322_s0 + $0x88] sm:$0xff]  ;;  %v2138_v35 = vsub.s32 0, %v2038_v1  ;;  %v2151_v39 = vsub.s32 4, %v2038_v1 }
   0xa   :  { %v173_v13 = vld [vmem:[%s3322_s0 + $0x90] sm:$0xff]  ;;  %v155_v14 = vld [vmem:[%s3322_s0] sm:$0xff]  ;;  %v174_v15 = vld [vmem:[%s3322_s0 + $0x98] sm:$0xff]  ;;  %v1998_v40 = vmov 0   ;;  %v2159_v42 = vadd.s32 8, %v2038_v1  ;;  %v2164_v44 = vadd.s32 16, %v2038_v1 }
   0xb   :  { %v156_v16 = vld [vmem:[%s3322_s0 + $0x8] sm:$0xff]  ;;  %v175_v17 = vld [vmem:[%s3322_s0 + $0xa0] sm:$0xff]  ;;  %v157_v18 = vld [vmem:[%s3322_s0 + $0x10] sm:$0xff]  ;;  %v403_v38 = vrot.slane %v2043_v2, %v2138_v35  ;;  %v407_v43 = vrot.slane %v2043_v2, %v2151_v39  ;;  %v2167_v45 = vadd.s32 24, %v2038_v1  ;;  %vm3328_vm0 = vcmask 588800   ;;  %s2006_s9 = smov [#allocation5]  }
   0xc   :  { %431 = vrot.lane.b32.xlu1 %v428_v9, %s1996_s20  ;;  %418 = vrot.lane.b32.xlu0 %v415_v10, %s1997_s21  ;;  %v176_v19 = vld [vmem:[%s3322_s0 + $0xa8] sm:$0xff]  ;;  %v158_v20 = vld [vmem:[%s3322_s0 + $0x18] sm:$0xff]  ;;  %v1999_v46 = vmov 1   ;;  %v2175_v48 = vadd.s32 32, %v2038_v1  ;;  %v2178_v49 = vadd.s32 40, %v2038_v1  ;;  %v2186_v51 = vadd.s32 48, %v2038_v1 }
   0xd   :  { %v177_v21 = vld [vmem:[%s3322_s0 + $0xb0] sm:$0xff]  ;;  %v159_v22 = vld [vmem:[%s3322_s0 + $0x20] sm:$0xff]  ;;  %v178_v23 = vld [vmem:[%s3322_s0 + $0xb8] sm:$0xff]  ;;  %v2156_v41 = vrot.slane %v403_v38, %v2138_v35  ;;  %vm3329_vm5 = vcmask 130048   ;;  %v2205_v55 = vadd.s32 56, %v2038_v1  ;;  %v2260_v7 = vadd.s32 64, %v2038_v1 }
   0xe   :  { %v160_v24 = vld [vmem:[%s3322_s0 + $0x28] sm:$0xff]  ;;  %v179_v25 = vld [vmem:[%s3322_s0 + $0xc0] sm:$0xff]  ;;  %v161_v26 = vld [vmem:[%s3322_s0 + $0x30] sm:$0xff]  ;;  %v2000_v63 = vmov 1.0|1.0   ;;  %v2263_v8 = vadd.s32 72, %v2038_v1 }
   0xf   :  { %v162_v27 = vld [vmem:[%s3322_s0 + $0x38] sm:$0xff]  ;;  %v163_v28 = vld [vmem:[%s3322_s0 + $0x40] sm:$0xff]  ;;  %v164_v29 = vld [vmem:[%s3322_s0 + $0x48] sm:$0xff]  ;;  %vm486_vm1 = vcmp.eq.s32.totalorder %v2038_v1, %v2156_v41  ;;  %vm491_vm2 = vcmp.eq.s32.totalorder %v2159_v42, %v2156_v41  ;;  %vm496_vm3 = vcmp.eq.s32.totalorder %v2164_v44, %v2156_v41  ;;  %vm501_vm4 = vcmp.eq.s32.totalorder %v2167_v45, %v2156_v41  ;;  %s1609_s10 = sshll.u32 %s2006_s9, 4  ;;  %s1610_s10 = int_to_ptr.vmem [resolvable:$true] %s1609_s10 }
  0x10   :  { %v165_v30 = vld [vmem:[%s3322_s0 + $0x50] sm:$0xff]  ;;  %v166_v31 = vld [vmem:[%s3322_s0 + $0x58] sm:$0xff]  ;;  %v167_v32 = vld [vmem:[%s3322_s0 + $0x60] sm:$0xff]  ;;  %vm506_vm7 = vcmp.eq.s32.totalorder %v2175_v48, %v2156_v41  ;;  %vm511_vm8 = vcmp.eq.s32.totalorder %v2178_v49, %v2156_v41  ;;  %vm516_vm9 = vcmp.eq.s32.totalorder %v2186_v51, %v2156_v41  ;;  %v3338_v10 = vmov 0  ;;  %s1972_s13 = scalar_lea.vmem %s1610_s10, 16  ;;  %s1976_s14 = scalar_lea.vmem %s1610_s10, 32 }
  0x11   :  { %v168_v33 = vld [vmem:[%s3322_s0 + $0x68] sm:$0xff]  ;;  %v169_v34 = vld [vmem:[%s3322_s0 + $0x70] sm:$0xff]  ;;  %v170_v36 = vld [vmem:[%s3322_s0 + $0x78] sm:$0xff]  ;;  %v3387_v9 = vmov 0  ;;  %p1973_p0 = scmp.ne.s32.totalorder %s1610_s10, %s1972_s13  ;;  %p1977_p1 = scmp.lt.s32.totalorder %s1610_s10, %s1610_s10 }
  0x12   :  { %v2146_v37 = vld [vmem:[%s3326_s4] sm:$0xff]  ;;  %v2194_v53 = vld [vmem:[%s3326_s4 + $0x8] sm:$0x3]  ;;  %vm2196_vm6 = vmpackc.low %vm491_vm2, %vm486_vm1  ;;  %vm521_vm2 = vcmp.eq.s32.totalorder %v2205_v55, %v2156_v41  ;;  %p1978_p2 = scmp.lt.s32.totalorder %s1976_s14, %s1972_s13 }
  0x13   :  { %vm2226_vm14 = vmpackc.low %vm501_vm4, %vm496_vm3  ;;  %v3179_v58 = vld [vmem:[%s3325_s3] sm:$0x77]  ;;  %s2004_s3 = smov 112  }
  0x14   :  { %p1979_p3 = por %p1978_p2, %p1977_p1 }
  0x16   :  { %p1980_p4 = pnand %p1979_p3, %p1973_p0 }
  0x2a   :  { %212 = vxpose.xlu0.b32.start [1/9] (short) (narrow) %v171_v11, 16  ;;  %v2001_v11 = vmov 2  }
  0x2e   :  { %213 = vxpose.xlu0.b32.cont [2/9] (short) (narrow) %v172_v12, 16  ;;  %v2313_v12 = vadd.s32 80, %v2038_v1 }
  0x32   :  { %214 = vxpose.xlu0.b32.cont [3/9] (short) (narrow) %v173_v13, 16  ;;  %v2316_v13 = vadd.s32 88, %v2038_v1 }
  0x35   :  { %180 = vxpose.xlu1.b32.start [1/16] (narrow) %v155_v14, 16 }
  0x36   :  { %215 = vxpose.xlu0.b32.cont [4/9] (short) (narrow) %v174_v15, 16  ;;  %v2354_v15 = vadd.s32 96, %v2038_v1 }
  0x39   :  { %181 = vxpose.xlu1.b32.cont [2/16] (narrow) %v156_v16, 16  ;;  %v2357_v16 = vadd.s32 104, %v2038_v1 }
  0x3a   :  { %216 = vxpose.xlu0.b32.cont [5/9] (short) (narrow) %v175_v17, 16 }
  0x3d   :  { %182 = vxpose.xlu1.b32.cont [3/16] (narrow) %v157_v18, 16  ;;  %v2393_v18 = vadd.s32 112, %v2038_v1 }
  0x3e   :  { %217 = vxpose.xlu0.b32.cont [6/9] (short) (narrow) %v176_v19, 16  ;;  %v2396_v19 = vadd.s32 120, %v2038_v1 }
  0x41   :  { %183 = vxpose.xlu1.b32.cont [4/16] (narrow) %v158_v20, 16 }
  0x42   :  { %218 = vxpose.xlu0.b32.cont [7/9] (short) (narrow) %v177_v21, 16  ;;  %v2443_v21 = vadd.s32 128, %v2038_v1 }
  0x45   :  { %184 = vxpose.xlu1.b32.cont [5/16] (narrow) %v159_v22, 16  ;;  %v2446_v22 = vadd.s32 136, %v2038_v1 }
  0x46   :  { %219 = vxpose.xlu0.b32.cont [8/9] (short) (narrow) %v178_v23, 16  ;;  %v3347_v23 = vmov 0 }
  0x49   :  { %185 = vxpose.xlu1.b32.cont [6/16] (narrow) %v160_v24, 16 }
  0x4a   :  { %220 = vxpose.xlu0.b32.end [9/9] (short) (narrow) %v179_v25, 16  ;;  %v2504_v25 = vadd.s32 144, %v2038_v1 }
  0x4d   :  { %186 = vxpose.xlu1.b32.cont [7/16] (narrow) %v161_v26, 16  ;;  %v2507_v26 = vadd.s32 152, %v2038_v1 }
  0x51   :  { %187 = vxpose.xlu1.b32.cont [8/16] (narrow) %v162_v27, 16  ;;  %v3412_v27 = vmov 0 }
  0x55   :  { %188 = vxpose.xlu1.b32.cont [9/16] (narrow) %v163_v28, 16 }
  0x59   :  { %189 = vxpose.xlu1.b32.cont [10/16] (narrow) %v164_v29, 16 }
  0x5d   :  { %190 = vxpose.xlu1.b32.cont [11/16] (narrow) %v165_v30, 16 }
  0x61   :  { %191 = vxpose.xlu1.b32.cont [12/16] (narrow) %v166_v31, 16 }
  0x65   :  { %192 = vxpose.xlu1.b32.cont [13/16] (narrow) %v167_v32, 16 }
  0x69   :  { %193 = vxpose.xlu1.b32.cont [14/16] (narrow) %v168_v33, 16  ;;  %v2582_v33 = vadd.s32 160, %v2038_v1 }
  0x6d   :  { %194 = vxpose.xlu1.b32.cont [15/16] (narrow) %v169_v34, 16  ;;  %v2585_v34 = vadd.s32 168, %v2038_v1 }
  0x71   :  { %195 = vxpose.xlu1.b32.end [16/16] (narrow) %v170_v36, 16 }
  0x73   :  { %1943 = vset.pattern.permute.xlu0 %v1998_v40 }
  0x74   :  { %1098 = vperm.xlu0 %1943, %v2146_v37  }
  0x78   :  { %1945 = vset.pattern.permute.xlu0 %v1999_v46  ;;  %v2640_v46 = vld [vmem:[%s3323_s1] sm:$0x3] }
  0x79   :  { %1255 = vperm.xlu0 %1945, %v2146_v37  }
  0x7a   :  { %v417_v47 = vpop.permute.xlu0 %416  ;;  %v2210_v56 = vpop.permute.xlu1 %429 }
  0x7b   :  { %v435_v50 = vsel %vm3328_vm0, %v407_v43, %v417_v47 }
  0x7c   :  { %v2189_v52 = vrot.slane %v435_v50, %v2138_v35  ;;  %v2657_v50 = vadd.s32 176, %v2038_v1 }
  0x7d   :  { %1259 = vperm.xlu0 %1945, %v2194_v53  }
  0x7e   :  { %v419_v57 = vpop.permute.xlu0 %418  ;;  %vm487_vm10 = vcmp.eq.s32.totalorder %v2038_v1, %v2189_v52  ;;  %vm492_vm11 = vcmp.eq.s32.totalorder %v2159_v42, %v2189_v52  ;;  %vm497_vm12 = vcmp.eq.s32.totalorder %v2164_v44, %v2189_v52  ;;  %vm502_vm13 = vcmp.eq.s32.totalorder %v2167_v45, %v2189_v52  ;;  %v432_v29 = vpop.permute.xlu1 %431 }
  0x7f   :  { %v420_v59 = vsel %vm3328_vm0, %v417_v47, %v419_v57  ;;  %v436_v60 = vsel %vm3329_vm5, %v419_v57, %v2210_v56  ;;  %vm1774_vm15 = vmpackc.low %vm492_vm11, %vm487_vm10  ;;  %vm507_vm1 = vcmp.eq.s32.totalorder %v2175_v48, %v2189_v52  ;;  %vm512_vm4 = vcmp.eq.s32.totalorder %v2178_v49, %v2189_v52 }
  0x80   :  { %v2238_v61 = vrot.slane %v420_v59, %v2138_v35  ;;  %v2241_v62 = vrot.slane %v436_v60, %v2138_v35  ;;  %1775 = vmatprep.subr.msk.bf16.mxu0 %vm1774_vm15, %v2000_v63  ;;  %vm1778_vm3 = vmpackc.low %vm502_vm13, %vm497_vm12  ;;  %vm531_vm0 = vcmp.eq.s32.totalorder %v2263_v8, %v2156_v41  ;;  %v2686_v57 = vadd.s32 192, %v2038_v1 }
  0x81   :  { %1777 = vmatpush1.bf16.msk.msra.mxu0 %vm2196_vm6, %v2000_v63  ;;  %vm2255_vm10 = vmpackc.low %vm511_vm8, %vm506_vm7  ;;  %1946 = vset.pattern.permute.xlu0 %v2001_v11  ;;  %v3378_v59 = vmov 0  ;;  %v3391_v11 = vmov 0 }
  0x82   :  { %1779 = vmatprep.subr.msk.bf16.mxu0 %vm1778_vm3, %v2000_v63  ;;  %vm489_vm6 = vcmp.eq.s32.totalorder %v2038_v1, %v2241_v62  ;;  %vm494_vm11 = vcmp.eq.s32.totalorder %v2159_v42, %v2241_v62  ;;  %vm488_vm7 = vcmp.eq.s32.totalorder %v2038_v1, %v2238_v61  ;;  %vm493_vm8 = vcmp.eq.s32.totalorder %v2159_v42, %v2238_v61  ;;  %vm2277_vm12 = vmpackc.low %vm512_vm4, %vm507_vm1 }
  0x83   :  { %vm2287_vm13 = vmpackc.low %vm521_vm2, %vm516_vm9  ;;  %vm499_vm3 = vcmp.eq.s32.totalorder %v2164_v44, %v2241_v62  ;;  %vm504_vm1 = vcmp.eq.s32.totalorder %v2167_v45, %v2241_v62  ;;  %vm526_vm4 = vcmp.eq.s32.totalorder %v2260_v7, %v2156_v41  ;;  %vm517_vm2 = vcmp.eq.s32.totalorder %v2186_v51, %v2189_v52  ;;  %1426 = vperm.xlu0 %1946, %v2146_v37  }
  0x84   :  { %v3339_v10 = vsel %vm2287_vm13, 4294967295, %v3338_v10  ;;  %vm1827_vm15 = vmpackc.low %vm494_vm11, %vm489_vm6  ;;  %vm522_vm6 = vcmp.eq.s32.totalorder %v2205_v55, %v2189_v52  ;;  %vm498_vm5 = vcmp.eq.s32.totalorder %v2164_v44, %v2238_v61  ;;  %vm513_vm13 = vcmp.eq.s32.totalorder %v2178_v49, %v2238_v61 }
  0x85   :  { %1828 = vmatprep.subr.msk.bf16.mxu1 %vm1827_vm15, %v2000_v63  ;;  %vm1829_vm9 = vmpackc.low %vm493_vm8, %vm488_vm7  ;;  %1781 = vmatpush1.bf16.msk.msra.mxu0 %vm2226_vm14, %v2000_v63  ;;  %vm503_vm15 = vcmp.eq.s32.totalorder %v2167_v45, %v2238_v61  ;;  %vm509_vm14 = vcmp.eq.s32.totalorder %v2175_v48, %v2241_v62  ;;  %vm514_vm7 = vcmp.eq.s32.totalorder %v2178_v49, %v2241_v62 }
  0x86   :  { %1830 = vmatpush1.bf16.msk.msra.mxu1 %vm1829_vm9, %v2000_v63  ;;  %vm1831_vm11 = vmpackc.low %vm504_vm1, %vm499_vm3  ;;  %1783 = vmatprep.subr.msk.bf16.mxu0 %vm2277_vm12, %v2000_v63  ;;  %vm536_vm12 = vcmp.eq.s32.totalorder %v2313_v12, %v2156_v41  ;;  %vm541_vm1 = vcmp.eq.s32.totalorder %v2316_v13, %v2156_v41 }
  0x87   :  { %1832 = vmatprep.subr.msk.bf16.mxu1 %vm1831_vm11, %v2000_v63  ;;  %vm2332_vm8 = vmpackc.low %vm531_vm0, %vm526_vm4  ;;  %vm508_vm11 = vcmp.eq.s32.totalorder %v2175_v48, %v2238_v61  ;;  %vm527_vm4 = vcmp.eq.s32.totalorder %v2260_v7, %v2189_v52  ;;  %1430 = vperm.xlu0 %1946, %v2194_v53  }
  0x88   :  { %vm1786_vm3 = vmpackc.low %vm522_vm6, %vm517_vm2  ;;  %vm532_vm2 = vcmp.eq.s32.totalorder %v2263_v8, %v2189_v52 }
  0x89   :  { %vm1833_vm9 = vmpackc.low %vm503_vm15, %vm498_vm5  ;;  %1785 = vmatpush1.bf16.msk.msra.mxu0 %vm2255_vm10, %v2000_v63  ;;  %vm519_vm5 = vcmp.eq.s32.totalorder %v2186_v51, %v2241_v62  ;;  %vm524_vm10 = vcmp.eq.s32.totalorder %v2205_v55, %v2241_v62 }
  0x8a   :  { %1834 = vmatpush1.bf16.msk.msra.mxu1 %vm1833_vm9, %v2000_v63  ;;  %vm1835_vm0 = vmpackc.low %vm514_vm7, %vm509_vm14  ;;  %1787 = vmatprep.subr.msk.bf16.mxu0 %vm1786_vm3, %v2000_v63  ;;  %vm546_vm14 = vcmp.eq.s32.totalorder %v2354_v15, %v2156_v41  ;;  %vm551_vm7 = vcmp.eq.s32.totalorder %v2357_v16, %v2156_v41  ;;  %vm518_vm9 = vcmp.eq.s32.totalorder %v2186_v51, %v2238_v61 }
  0x8b   :  { %1836 = vmatprep.subr.msk.bf16.mxu1 %vm1835_vm0, %v2000_v63  ;;  %vm2371_vm6 = vmpackc.low %vm541_vm1, %vm536_vm12  ;;  %vm523_vm0 = vcmp.eq.s32.totalorder %v2205_v55, %v2238_v61  ;;  %vm3344_vm12 = vnez %v3339_v10  ;;  %vm537_vm1 = vcmp.eq.s32.totalorder %v2313_v12, %v2189_v52 }
  0x8c   :  { %vm1837_vm15 = vmpackc.low %vm513_vm13, %vm508_vm11  ;;  %vm542_vm11 = vcmp.eq.s32.totalorder %v2316_v13, %v2189_v52 }
  0x8d   :  { %vm1790_vm3 = vmpackc.low %vm532_vm2, %vm527_vm4  ;;  %1789 = vmatpush1.bf16.msk.msra.mxu0 %vm3344_vm12, %v2000_v63  ;;  %vm529_vm4 = vcmp.eq.s32.totalorder %v2260_v7, %v2241_v62  ;;  %vm534_vm2 = vcmp.eq.s32.totalorder %v2263_v8, %v2241_v62  ;;  %vm556_vm12 = vcmp.eq.s32.totalorder %v2393_v18, %v2156_v41 }
  0x8e   :  { %1838 = vmatpush1.bf16.msk.msra.mxu1 %vm1837_vm15, %v2000_v63  ;;  %vm1839_vm13 = vmpackc.low %vm524_vm10, %vm519_vm5  ;;  %1791 = vmatprep.subr.msk.bf16.mxu0 %vm1790_vm3, %v2000_v63  ;;  %vm528_vm15 = vcmp.eq.s32.totalorder %v2260_v7, %v2238_v61  ;;  %vm533_vm3 = vcmp.eq.s32.totalorder %v2263_v8, %v2238_v61 }
  0x8f   :  { %1840 = vmatprep.subr.msk.bf16.mxu1 %vm1839_vm13, %v2000_v63  ;;  %vm2410_vm5 = vmpackc.low %vm551_vm7, %vm546_vm14  ;;  %vm561_vm13 = vcmp.eq.s32.totalorder %v2396_v19, %v2156_v41  ;;  %1944 = vset.pattern.permute.xlu1 %v1998_v40  ;;  %vm547_vm7 = vcmp.eq.s32.totalorder %v2354_v15, %v2189_v52 }
  0x90   :  { %vm1841_vm10 = vmpackc.low %vm523_vm0, %vm518_vm9  ;;  %vm552_vm9 = vcmp.eq.s32.totalorder %v2357_v16, %v2189_v52  ;;  %1103 = vperm.xlu1 %1944, %v2194_v53   ;;  %v2660_v53 = vadd.s32 184, %v2038_v1 }
  0x91   :  { %vm1794_vm14 = vmpackc.low %vm542_vm11, %vm537_vm1  ;;  %1793 = vmatpush1.bf16.msk.msra.mxu0 %vm2332_vm8, %v2000_v63  ;;  %vm539_vm1 = vcmp.eq.s32.totalorder %v2313_v12, %v2241_v62  ;;  %vm544_vm11 = vcmp.eq.s32.totalorder %v2316_v13, %v2241_v62 }
  0x92   :  { %1842 = vmatpush1.bf16.msk.msra.mxu1 %vm1841_vm10, %v2000_v63  ;;  %vm1843_vm0 = vmpackc.low %vm534_vm2, %vm529_vm4  ;;  %1795 = vmatprep.subr.msk.bf16.mxu0 %vm1794_vm14, %v2000_v63  ;;  %vm538_vm4 = vcmp.eq.s32.totalorder %v2313_v12, %v2238_v61  ;;  %vm543_vm2 = vcmp.eq.s32.totalorder %v2316_v13, %v2238_v61  ;;  %vm562_vm14 = vcmp.eq.s32.totalorder %v2396_v19, %v2189_v52 }
  0x93   :  { %1844 = vmatprep.subr.msk.bf16.mxu1 %vm1843_vm0, %v2000_v63  ;;  %vm1845_vm8 = vmpackc.low %vm533_vm3, %vm528_vm15  ;;  %vm557_vm3 = vcmp.eq.s32.totalorder %v2393_v18, %v2189_v52  ;;  %vm566_vm0 = vcmp.eq.s32.totalorder %v2443_v21, %v2156_v41 }
  0x94   :  { %vm2466_vm10 = vmpackc.low %vm561_vm13, %vm556_vm12  ;;  %vm548_vm12 = vcmp.eq.s32.totalorder %v2354_v15, %v2238_v61 }
  0x95   :  { %v3348_v23 = vsel %vm2466_vm10, 4294967295, %v3347_v23  ;;  %vm1798_vm15 = vmpackc.low %vm552_vm9, %vm547_vm7  ;;  %vm549_vm10 = vcmp.eq.s32.totalorder %v2354_v15, %v2241_v62  ;;  %vm554_vm7 = vcmp.eq.s32.totalorder %v2357_v16, %v2241_v62  ;;  %1797 = vmatpush1.bf16.msk.msra.mxu0 %vm2371_vm6, %v2000_v63 }
  0x96   :  { %vm1847_vm13 = vmpackc.low %vm544_vm11, %vm539_vm1  ;;  %1846 = vmatpush1.bf16.msk.msra.mxu1 %vm1845_vm8, %v2000_v63  ;;  %vm553_vm1 = vcmp.eq.s32.totalorder %v2357_v16, %v2238_v61  ;;  %1799 = vmatprep.subr.msk.bf16.mxu0 %vm1798_vm15, %v2000_v63  ;;  %vm567_vm11 = vcmp.eq.s32.totalorder %v2443_v21, %v2189_v52  ;;  %vm572_vm8 = vcmp.eq.s32.totalorder %v2446_v22, %v2189_v52 }
  0x97   :  { %vm2495_vm9 = vmpackc.low %vm543_vm2, %vm538_vm4  ;;  %1848 = vmatprep.subr.msk.bf16.mxu1 %vm1847_vm13, %v2000_v63  ;;  %vm3353_vm4 = vcmp.eq.s32.totalorder %v2446_v22, %v2156_v41 }
  0x98   :  { %vm2517_vm6 = vmpackc.low %vm562_vm14, %vm557_vm3  ;;  %vm559_vm3 = vcmp.eq.s32.totalorder %v2393_v18, %v2241_v62  ;;  %vm564_vm14 = vcmp.eq.s32.totalorder %v2396_v19, %v2241_v62 }
  0x99   :  { %vm2531_vm2 = vmpackc.low %vm3353_vm4, %vm566_vm0  ;;  %vm576_vm0 = vcmp.eq.s32.totalorder %v2504_v25, %v2156_v41  ;;  %vm563_vm4 = vcmp.eq.s32.totalorder %v2396_v19, %v2238_v61  ;;  %1801 = vmatpush1.bf16.msk.msra.mxu0 %vm2410_vm5, %v2000_v63  ;;  %vm3362_vm5 = vcmask 130048  }
  0x9a   :  { %vm2541_vm15 = vmpackc.low %vm554_vm7, %vm549_vm10  ;;  %vm558_vm7 = vcmp.eq.s32.totalorder %v2393_v18, %v2238_v61  ;;  %1850 = vmatpush1.bf16.msk.msra.mxu1 %vm2495_vm9, %v2000_v63  ;;  %v434_v36 = vsel %vm3362_vm5, %v2210_v56, %v432_v29  ;;  %1803 = vmatprep.subr.msk.bf16.mxu0 %vm2517_vm6, %v2000_v63  ;;  %vm574_vm6 = vcmp.eq.s32.totalorder %v2446_v22, %v2241_v62 }
  0x9b   :  { %vm2559_vm10 = vmpackc.low %vm553_vm1, %vm548_vm12  ;;  %vm577_vm12 = vcmp.eq.s32.totalorder %v2504_v25, %v2189_v52  ;;  %vm582_vm1 = vcmp.eq.s32.totalorder %v2507_v26, %v2189_v52  ;;  %1852 = vmatprep.subr.msk.bf16.mxu1 %vm2541_vm15, %v2000_v63  ;;  %vm573_vm5 = vcmp.eq.s32.totalorder %v2446_v22, %v2238_v61  ;;  %v2663_v54 = vrot.slane %v434_v36, %v2138_v35 }
  0x9c   :  { %vm2573_vm13 = vmpackc.low %vm572_vm8, %vm567_vm11  ;;  %vm569_vm11 = vcmp.eq.s32.totalorder %v2443_v21, %v2241_v62  ;;  %vm3365_vm8 = vcmp.eq.s32.totalorder %v2507_v26, %v2156_v41 }
  0x9d   :  { %vm2601_vm9 = vmpackc.low %vm564_vm14, %vm559_vm3  ;;  %vm568_vm14 = vcmp.eq.s32.totalorder %v2443_v21, %v2238_v61 }
  0x9e   :  { %vm2615_vm15 = vmpackc.low %vm3365_vm8, %vm576_vm0  ;;  %vm586_vm0 = vcmp.eq.s32.totalorder %v2582_v33, %v2156_v41  ;;  %1854 = vmatpush1.bf16.msk.msra.mxu1 %vm2559_vm10, %v2000_v63  ;;  %vm579_vm8 = vcmp.eq.s32.totalorder %v2504_v25, %v2241_v62 }
  0x9f   :  { %vm2625_vm3 = vmpackc.low %vm563_vm4, %vm558_vm7  ;;  %vm587_vm4 = vcmp.eq.s32.totalorder %v2582_v33, %v2189_v52  ;;  %1856 = vmatprep.subr.msk.bf16.mxu1 %vm2601_vm9, %v2000_v63  ;;  %vm597_vm9 = vcmp.eq.s32.totalorder %v2657_v50, %v2189_v52 }
  0xa0   :  { %vm2648_vm7 = vmpackc.low %vm582_vm1, %vm577_vm12  ;;  %vm3372_vm12 = vnez %v3348_v23  ;;  %v2002_v23 = vmov 0.0  }
  0xa1   :  { %1805 = vmatpush1.bf16.msk.msra.mxu0 %vm3372_vm12, %v2000_v63  ;;  %vm2677_vm1 = vmpackc.low %vm574_vm6, %vm569_vm11  ;;  %vm584_vm12 = vcmp.eq.s32.totalorder %v2507_v26, %v2241_v62 }
  0xa2   :  { %1807 = vmatprep.subr.msk.bf16.mxu0 %vm2573_vm13, %v2000_v63  ;;  %vm2700_vm10 = vmpackc.low %vm573_vm5, %vm568_vm14  ;;  %vm3377_vm13 = vcmp.eq.s32.totalorder %v2585_v34, %v2156_v41  ;;  %1858 = vmatpush1.bf16.msk.msra.mxu1 %vm2625_vm3, %v2000_v63  ;;  %vm3389_vm5 = vcmp.ge.s32.totalorder %v2640_v46, 0  ;;  %vm500_vm3 = vcmp.eq.s32.totalorder %v2164_v44, %v2663_v54  ;;  %vm505_vm14 = vcmp.eq.s32.totalorder %v2167_v45, %v2663_v54 }
  0xa3   :  { %vm2710_vm11 = vmpackc.low %vm3377_vm13, %vm586_vm0  ;;  %vm3380_vm0 = vcmp.eq.s32.totalorder %v2585_v34, %v2189_v52  ;;  %v2776_v10 = vsel %vm3389_vm5, 1, %v1998_v40  ;;  %1860 = vmatprep.subr.msk.bf16.mxu1 %vm2677_vm1, %v2000_v63  ;;  %vm3390_vm5 = vcmp.eq.s32.totalorder %v2660_v53, %v2189_v52  ;;  %v3395_v44 = vmov 0 }
  0xa4   :  { %v3379_v59 = vsel %vm2710_vm11, 4294967295, %v3378_v59  ;;  %vm2727_vm13 = vmpackc.low %vm3380_vm0, %vm587_vm4  ;;  %vm604_vm1 = vcmp.eq.s32.totalorder %v2660_v53, %v2241_v62  ;;  %v256_v14 = vrot.slane %v2776_v10, %v2049_v4  ;;  %vm3401_vm0 = vcmp.eq.s32.totalorder %v2582_v33, %v2238_v61 }
  0xa5   :  { %vm2745_vm4 = vmpackc.low %vm584_vm12, %vm579_vm8  ;;  %1809 = vmatpush1.bf16.msk.msra.mxu0 %vm2531_vm2, %v2000_v63  ;;  %vm3385_vm8 = vcmp.eq.s32.totalorder %v2504_v25, %v2238_v61  ;;  %vm3386_vm12 = vcmp.eq.s32.totalorder %v2507_v26, %v2238_v61  ;;  %v252_v37 = vrot.slane %v2776_v10, %v2138_v35 }
  0xa6   :  { %vm2769_vm6 = vmpackc.low %vm3386_vm12, %vm3385_vm8  ;;  %1811 = vmatprep.subr.msk.bf16.mxu0 %vm2648_vm7, %v2000_v63  ;;  %vm3393_vm12 = vcmp.eq.s32.totalorder %v2657_v50, %v2156_v41  ;;  %vm3394_vm7 = vcmp.eq.s32.totalorder %v2660_v53, %v2156_v41  ;;  %1862 = vmatpush1.bf16.msk.msra.mxu1 %vm2700_vm10, %v2000_v63  ;;  %vm540_vm10 = vcmp.eq.s32.totalorder %v2313_v12, %v2663_v54 }
  0xa7   :  { %v3388_v9 = vsel %vm2769_vm6, 4294967295, %v3387_v9  ;;  %vm2796_vm8 = vmpackc.low %vm3390_vm5, %vm597_vm9  ;;  %vm515_vm9 = vcmp.eq.s32.totalorder %v2178_v49, %v2663_v54  ;;  %vm3397_vm5 = vcmp.eq.s32.totalorder %v2582_v33, %v2241_v62  ;;  %1864 = vmatprep.subr.msk.bf16.mxu1 %vm2745_vm4, %v2000_v63 }
  0xa8   :  { %v3392_v11 = vsel %vm2796_vm8, 4294967295, %v3391_v11  ;;  %vm2806_vm2 = vmpackc.low %vm3394_vm7, %vm3393_vm12  ;;  %vm3398_vm8 = vcmp.eq.s32.totalorder %v2585_v34, %v2241_v62  ;;  %vm520_vm12 = vcmp.eq.s32.totalorder %v2186_v51, %v2663_v54  ;;  %vm535_vm7 = vcmp.eq.s32.totalorder %v2263_v8, %v2663_v54 }
  0xa9   :  { %v3396_v44 = vsel %vm2806_vm2, 4294967295, %v3395_v44  ;;  %vm2822_vm6 = vmpackc.low %vm3398_vm8, %vm3397_vm5  ;;  %vm3402_vm2 = vcmp.eq.s32.totalorder %v2585_v34, %v2238_v61  ;;  %vm530_vm5 = vcmp.eq.s32.totalorder %v2260_v7, %v2663_v54  ;;  %1813 = vmatpush1.bf16.msk.msra.mxu0 %vm2615_vm15, %v2000_v63  ;;  %vm3411_vm15 = vcmp.eq.s32.totalorder %v2175_v48, %v2663_v54 }
  0xaa   :  { %vm2838_vm11 = vmpackc.low %vm3402_vm2, %vm3401_vm0  ;;  %vm3410_vm2 = vcmp.eq.s32.totalorder %v2686_v57, %v2156_v41  ;;  %1815 = vmatprep.subr.msk.bf16.mxu0 %vm2727_vm13, %v2000_v63  ;;  %v3415_v41 = vmov 0  ;;  %vm550_vm13 = vcmp.eq.s32.totalorder %v2354_v15, %v2663_v54  ;;  %v3425_v8 = vmov 0  ;;  %v228_v12 = vpop.trf.xlu0 }
  0xab   :  { %vm2842_vm8 = vmpackc.low %vm505_vm14, %vm500_vm3  ;;  %vm3407_vm14 = vcmp.eq.s32.totalorder %v2657_v50, %v2241_v62  ;;  %v1769_v24 = vsel %vm3410_vm2, 1.0, %v2002_v23 }
  0xac   :  { %vm2859_vm0 = vmpackc.low %vm604_vm1, %vm3407_vm14  ;;  %vm545_vm1 = vcmp.eq.s32.totalorder %v2316_v13, %v2663_v54  ;;  %vm3414_vm14 = vcmp.eq.s32.totalorder %v2205_v55, %v2663_v54  ;;  %v3430_v13 = vmov 0 }
  0xad   :  { %vm2870_vm3 = vmpackc.low %vm515_vm9, %vm3411_vm15  ;;  %vm607_vm9 = vcmp.eq.s32.totalorder %v2686_v57, %v2189_v52  ;;  %vm555_vm15 = vcmp.eq.s32.totalorder %v2357_v16, %v2663_v54  ;;  %v921_v52 = vpack.c.bf16 %v1769_v24, %v1769_v24 }
  0xae   :  { %v3413_v27 = vsel %vm2870_vm3, 4294967295, %v3412_v27  ;;  %vm2892_vm2 = vmpackc.low %vm3414_vm14, %vm520_vm12  ;;  %vm3423_vm12 = vnez %v3379_v59  ;;  %vm3424_vm14 = vnez %v3388_v9  ;;  %v1770_v7 = vsel %vm607_vm9, 1.0, %v2002_v23 }
  0xaf   :  { %v3416_v41 = vsel %vm2892_vm2, 4294967295, %v3415_v41  ;;  %vm2906_vm4 = vmpackc.low %vm535_vm7, %vm530_vm5  ;;  %vm2914_vm2 = vcmp.eq.s32.totalorder %v256_v14, 1  ;;  %1817 = vmatpush1.bf16.msk.msra.mxu0 %vm3423_vm12, %v2000_v63  ;;  %1866 = vmatpush1.bf16.msk.msra.mxu1 %vm3424_vm14, %v2000_v63  ;;  %vm580_vm5 = vcmp.eq.s32.totalorder %v2504_v25, %v2663_v54  ;;  %vm3427_vm12 = vnez %v3392_v11 }
  0xb0   :  { %vm2918_vm3 = vmpackc.low %vm545_vm1, %vm540_vm10  ;;  %1819 = vmatprep.subr.msk.bf16.mxu0 %vm3427_vm12, %v2000_v63  ;;  %1868 = vmatprep.subr.msk.bf16.mxu1 %vm2822_vm6, %v2000_v63  ;;  %v2967_v15 = vsel %vm2914_vm2, %v228_v12, 0.0  ;;  %vm3432_vm9 = vcmp.eq.s32.totalorder %v2443_v21, %v2663_v54  ;;  %vm3433_vm10 = vcmp.eq.s32.totalorder %v2446_v22, %v2663_v54  ;;  %vm931_vm12 = vcmask 1043456  }
  0xb1   :  { %vm2935_vm1 = vmpackc.low %vm555_vm15, %vm550_vm13  ;;  %vm3428_vm13 = vcmp.eq.s32.totalorder %v2393_v18, %v2663_v54  ;;  %vm3429_vm15 = vcmp.eq.s32.totalorder %v2396_v19, %v2663_v54  ;;  %v922_v18 = vpack.c.bf16 %v1770_v7, %v1770_v7  ;;  %vm603_vm7 = vcmp.eq.s32.totalorder %v2660_v53, %v2238_v61 }
  0xb2   :  { %v3426_v8 = vsel %vm2935_vm1, 4294967295, %v3425_v8  ;;  %vm2957_vm14 = vmpackc.low %vm3429_vm15, %vm3428_vm13  ;;  %vm3446_vm15 = vcmask 588800  }
  0xb3   :  { %v3431_v13 = vsel %vm2957_vm14, 4294967295, %v3430_v13  ;;  %vm2975_vm13 = vmpackc.low %vm3433_vm10, %vm3432_vm9  ;;  %vm3436_vm14 = vcmp.eq.s32.totalorder %v2507_v26, %v2663_v54  ;;  %vm3439_vm10 = vnez %v3396_v44  ;;  %1870 = vmatpush1.bf16.msk.msra.mxu1 %vm2838_vm11, %v2000_v63  ;;  %vm598_vm9 = vcmp.eq.s32.totalorder %v2657_v50, %v2238_v61 }
  0xb4   :  { %vm2989_vm1 = vmpackc.low %vm3436_vm14, %vm580_vm5  ;;  %1821 = vmatpush1.bf16.msk.msra.mxu0 %vm3439_vm10, %v2000_v63  ;;  %vm3440_vm5 = vcmp.eq.s32.totalorder %v2686_v57, %v2241_v62  ;;  %vm3441_vm14 = vcmp.eq.s32.totalorder %v2686_v57, %v2238_v61  ;;  %vm3442_vm10 = vcmp.eq.s32.totalorder %v2582_v33, %v2663_v54  ;;  %vm3443_vm11 = vcmp.eq.s32.totalorder %v2585_v34, %v2663_v54  ;;  %v229_v61 = vpop.trf.xlu0 }
  0xb5   :  { %v1772_v21 = vsel %vm3440_vm5, 1.0, %v2002_v23  ;;  %v1771_v22 = vsel %vm3441_vm14, 1.0, %v2002_v23  ;;  %vm3017_vm6 = vmpackc.low %vm3443_vm11, %vm3442_vm10  ;;  %v274_v26 = vsel %vm3446_vm15, %v2967_v15, -inf  ;;  %1822 = vmatprep.subr.msk.bf16.mxu0 %vm931_vm12, %v922_v18  ;;  %1872 = vmatprep.subr.msk.bf16.mxu1 %vm2859_vm0, %v2000_v63  ;;  %v933_v62 = vsel %vm931_vm12, %v921_v52, 0  ;;  %v196_v47 = vpop.trf.xlu1 }
  0xb6   :  { %vm3447_vm5 = vcmp.eq.s32.totalorder %v2657_v50, %v2663_v54  ;;  %vm3448_vm14 = vcmp.eq.s32.totalorder %v2660_v53, %v2663_v54  ;;  %v3040_v29 = vsel %vm2914_vm2, %v229_v61, 0.0  ;;  %vm3451_vm15 = vcmask 582656   ;;  %vm1873_vm0 = vmpackc.low %vm603_vm7, %vm598_vm9 }
  0xb7   :  { %vm3034_vm10 = vmpackc.low %vm3448_vm14, %vm3447_vm5  ;;  %v276_v30 = vsel %vm3451_vm15, %v3040_v29, -inf  ;;  %v924_v31 = vpack.c.bf16 %v1772_v21, %v1772_v21  ;;  %v923_v32 = vpack.c.bf16 %v1771_v22, %v1771_v22  ;;  %v927_v33 = vpack.c.bf16 %v3040_v29, %v2967_v15  ;;  %1874 = vmatpush1.bf16.msk.msra.mxu1 %vm1873_vm0, %v2000_v63 }
  0xb8   :  { %v277_v34 = vmax.f32 %v274_v26, %v276_v30  ;;  %972 = vmatpush1.bf16.msra.mxu0 %v933_v62  ;;  %vm3452_vm11 = vcmask 588800   ;;  %vm257_vm7 = vcmp.eq.s32.totalorder %v252_v37, 1  ;;  %vm264_vm9 = vcmask 1041408  }
  0xb9   :  { %1875 = vmatprep.subr.msk.bf16.mxu1 %vm931_vm12, %v924_v31  ;;  %1823 = vmatprep.mubr.msk.bf16.mxu0 %vm3452_vm11, %v927_v33  ;;  %vm3453_vm2 = vmmov %vm3452_vm11  ;;  %v939_v38 = vsel %vm931_vm12, %v923_v32, 0  ;;  %v197_v56 = vpop.trf.xlu1  ;;  %vm490_vm14 = vcmp.eq.s32.totalorder %v2038_v1, %v2663_v54  ;;  %vm495_vm15 = vcmp.eq.s32.totalorder %v2159_v42, %v2663_v54  ;;  %v3066_v9 = vsel %vm257_vm7, %v196_v47, 0.0 }
  0xba   :  { %v278_v36 = vrot.slane %v277_v34, 4  ;;  %1876 = vmatprep.mubr.msk.bf16.mxu1 %vm3453_vm2, %v927_v33  ;;  %1033 = vmatprep.subr.bf16.mxu0 %v1998_v40  ;;  %vm3054_vm5 = vmpackc.low %vm257_vm7, %vm257_vm7  ;;  %v3062_v59 = vsel %vm257_vm7, %v197_v56, 0.0  ;;  %v3064_v60 = vpack.c.bf16 %v197_v56, %v196_v47  ;;  %v329_v52 = vrot.slane %v2640_v46, %v2049_v4 }
  0xbb   :  { %1015 = vmatpush1.bf16.msra.mxu1 %v939_v38  ;;  %v265_v10 = vsel %vm264_vm9, %v3062_v59, -inf  ;;  %vm1880_vm0 = vmpackc.low %vm495_vm15, %vm490_vm14 }
  0xbc   :  { %v279_v43 = vmax.f32 %v277_v34, %v278_v36  ;;  %v266_v11 = vmax.f32 %v3066_v9, %v265_v10  ;;  %1826 = vmatmul.mubr.msk.bf16.vlgmr.msra.gmra.mrb[0].mxu0 %vm3054_vm5, %v3064_v60  ;;  %vm3456_vm11 = vmmov %vm3453_vm2  ;;  %vm3457_vm2 = vnez %v3413_v27  ;;  %vm331_vm7 = vcmp.eq.s32.totalorder %v2038_v1, %v329_v52 }
  0xbd   :  { %1881 = vmatpush1.bf16.msk.msra.mxu0 %vm1880_vm0, %v2000_v63  ;;  %1904 = vmatprep.mubr.msk.bf16.mxu0 %vm3456_vm11, %v927_v33  ;;  %vm333_vm14 = vcmp.eq.s32.totalorder %v2159_v42, %v329_v52  ;;  %v1646_v21 = vsel %vm331_vm7, 1.0, %v2002_v23  ;;  %vm3459_vm15 = vmmov %vm3456_vm11  ;;  %v325_v34 = vrot.slane %v2640_v46, %v2138_v35  ;;  %vm3460_vm0 = vcmask 582656  }
  0xbe   :  { %v280_v50 = vrot.slane %v279_v43, 2  ;;  %1879 = vmatmul.mubr.msk.bf16.vlgmr.msra.gmra.mrb[0].mxu1 %vm3054_vm5, %v3064_v60  ;;  %v267_v45 = vrot.slane %v266_v11, 4  ;;  %1035 = vmatprep.subr.bf16.mxu0 %v1998_v40  ;;  %v1648_v22 = vsel %vm333_vm14, 1.0, %v2002_v23  ;;  %v343_v61 = vmul.f32 %v1646_v21, %v2967_v15 }
  0xbf   :  { %v345_v62 = vmul.f32 %v1648_v22, %v3040_v29  ;;  %vm332_vm7 = vcmp.eq.s32.totalorder %v2159_v42, %v325_v34  ;;  %vm330_vm14 = vcmp.eq.s32.totalorder %v2038_v1, %v325_v34 }
  0xc0   :  { %v281_v53 = vmax.f32 %v279_v43, %v280_v50  ;;  %v268_v20 = vmax.f32 %v266_v11, %v267_v45  ;;  %v354_v37 = vsel %vm3456_vm11, %v343_v61, 0.0  ;;  %v1647_v50 = vsel %vm332_vm7, 1.0, %v2002_v23 }
  0xc1   :  { %1883 = vmatpush1.bf16.msk.msra.mxu0 %vm2842_vm8, %v2000_v63  ;;  %vm3458_vm8 = vnez %v3416_v41  ;;  %v344_v56 = vmul.f32 %v1647_v50, %v3062_v59  ;;  %v1645_v45 = vsel %vm330_vm14, 1.0, %v2002_v23 }
  0xc2   :  { %v282_v2 = vrot.slane %v281_v53, 1  ;;  %v269_v7 = vrot.slane %v268_v20, 2  ;;  %1037 = vmatprep.subr.bf16.mxu0 %v1998_v40 }
  0xc4   :  { %v3077_v44 = vmax.f32 %v281_v53, %v282_v2  ;;  %v270_v12 = vmax.f32 %v268_v20, %v269_v7 }
  0xc5   :  { %1885 = vmatpush1.bf16.msk.msra.mxu0 %vm3457_vm2, %v2000_v63  ;;  %vm3461_vm2 = vmmov %vm3460_vm0 }
  0xc6   :  { %v285_v14 = vsub.f32 %v2967_v15, %v3077_v44  ;;  %v287_v49 = vsub.f32 %v3040_v29, %v3077_v44  ;;  %v271_v18 = vrot.slane %v270_v12, 1  ;;  %1039 = vmatprep.subr.bf16.mxu0 %v1998_v40  ;;  %v355_v38 = vsel %vm3461_vm2, %v345_v62, 0.0 }
  0xc7   :  { %v356_v47 = vadd.f32 %v355_v38, %v354_v37 }
  0xc8   :  { %v290_v24 = vmul.f32 1.442695, %v285_v14  ;;  %v294_v51 = vmul.f32 1.442695, %v287_v49  ;;  %v3098_v17 = vmax.f32 %v270_v12, %v271_v18  ;;  %v346_v49 = vsel %vm264_vm9, %v344_v56, 0.0 }
  0xc9   :  { %1887 = vmatpush1.bf16.msk.msra.mxu0 %vm3458_vm8, %v2000_v63  ;;  %v357_v55 = vrot.slane %v356_v47, 4  ;;  %vm610_vm8 = vcmp.eq.s32.totalorder %v2686_v57, %v2663_v54 }
  0xca   :  { %1947 = vpow2.f32 %v290_v24  ;;  %v284_v27 = vsub.f32 %v3066_v9, %v3098_v17  ;;  %v286_v26 = vsub.f32 %v3062_v59, %v3098_v17  ;;  %1041 = vmatprep.subr.bf16.mxu0 %v1998_v40 }
  0xcb   :  { %1949 = vpow2.f32 %v294_v51  ;;  %v358_v24 = vadd.f32 %v357_v55, %v356_v47  ;;  %v342_v51 = vmul.f32 %v1645_v45, %v3066_v9 }
  0xcc   :  { %v288_v30 = vmul.f32 1.442695, %v284_v27  ;;  %v292_v31 = vmul.f32 1.442695, %v286_v26  ;;  %v1773_v26 = vsel %vm610_vm8, 1.0, %v2002_v23 }
  0xcd   :  { %1889 = vmatpush1.bf16.msk.msra.mxu0 %vm2906_vm4, %v2000_v63  ;;  %vm3462_vm4 = vnez %v3426_v8  ;;  %v347_v12 = vadd.f32 %v346_v49, %v342_v51  ;;  %v359_v18 = vrot.slane %v358_v24, 2  ;;  %v925_v57 = vpack.c.bf16 %v1773_v26, %v1773_v26 }
  0xce   :  { %1951 = vpow2.f32 %v288_v30  ;;  %1043 = vmatprep.subr.bf16.mxu0 %v1998_v40 }
  0xcf   :  { %1953 = vpow2.f32 %v292_v31  ;;  %v348_v22 = vrot.slane %v347_v12, 4  ;;  %v360_v27 = vadd.f32 %v359_v18, %v358_v24 }
  0xd1   :  { %1891 = vmatpush1.bf16.msk.msra.mxu0 %vm2918_vm3, %v2000_v63  ;;  %vm3463_vm3 = vnez %v3431_v13  ;;  %v349_v19 = vadd.f32 %v348_v22, %v347_v12  ;;  %v361_v30 = vrot.slane %v360_v27, 1 }
  0xd2   :  { %1045 = vmatprep.subr.bf16.mxu0 %v1998_v40 }
  0xd3   :  { %v362_v34 = vadd.f32 %v361_v30, %v360_v27 }
  0xd4   :  { %v1948_v32 = vpop.eup %1947 }
  0xd5   :  { %v1950_v41 = vpop.eup %1949  ;;  %v304_v33 = vsel %vm3459_vm15, %v1948_v32, 0.0  ;;  %1893 = vmatpush1.bf16.msk.msra.mxu0 %vm3462_vm4, %v2000_v63  ;;  %v350_v32 = vrot.slane %v349_v19, 2 }
  0xd6   :  { %v305_v36 = vsel %vm3460_vm0, %v1950_v41, 0.0  ;;  %1047 = vmatprep.subr.bf16.mxu0 %v1998_v40 }
  0xd7   :  { %v306_v43 = vadd.f32 %v305_v36, %v304_v33  ;;  %v945_v36 = vsel %vm931_vm12, %v925_v57, 0  ;;  %v351_v38 = vadd.f32 %v350_v32, %v349_v19  ;;  %vm1074_vm12 = vcmp.ge.s32.totalorder %v3179_v58, 0 }
  0xd8   :  { %v1952_v2 = vpop.eup %1951 }
  0xd9   :  { %v307_v48 = vrot.slane %v306_v43, 4  ;;  %v1954_v11 = vpop.eup %1953  ;;  %1895 = vmatpush1.bf16.msk.msra.mxu0 %vm3463_vm3, %v2000_v63 }
  0xda   :  { %1049 = vmatprep.subr.bf16.mxu0 %v1998_v40  ;;  %v296_v8 = vsel %vm264_vm9, %v1954_v11, 0.0 }
  0xdb   :  { %v308_v53 = vadd.f32 %v307_v48, %v306_v43  ;;  %v297_v20 = vadd.f32 %v1952_v2, %v296_v8 }
  0xdd   :  { %v309_v42 = vrot.slane %v308_v53, 2  ;;  %1897 = vmatpush1.bf16.msk.msra.mxu0 %vm2975_vm13, %v2000_v63  ;;  %v298_v7 = vrot.slane %v297_v20, 4  ;;  %vm381_vm13 = vcmask 581632  }
  0xde   :  { %1051 = vmatprep.subr.bf16.mxu0 %v1998_v40 }
  0xdf   :  { %v310_v10 = vadd.f32 %v309_v42, %v308_v53  ;;  %v299_v13 = vadd.f32 %v298_v7, %v297_v20 }
  0xe1   :  { %v311_v14 = vrot.slane %v310_v10, 1  ;;  %1899 = vmatpush1.bf16.msk.msra.mxu0 %vm2989_vm1, %v2000_v63  ;;  %v300_v21 = vrot.slane %v299_v13, 2  ;;  %vm3464_vm1 = vcmp.ge.s32.totalorder %v2640_v46, 0 }
  0xe2   :  { %1053 = vmatprep.subr.bf16.mxu0 %v1998_v40  ;;  %v1644_v54 = vsel %vm3464_vm1, 1.0, %v2002_v23  ;;  %vm1280_vm1 = vcmask 457728  }
  0xe3   :  { %v312_v52 = vadd.f32 %v311_v14, %v310_v10  ;;  %v301_v16 = vadd.f32 %v300_v21, %v299_v13  ;;  %v374_v41 = vrot.slane %v1644_v54, %v2049_v4  ;;  %v370_v47 = vrot.slane %v1644_v54, %v2138_v35 }
  0xe5   :  { %1955 = vlog2.f32 %v312_v52  ;;  %1901 = vmatpush1.bf16.msk.msra.mxu0 %vm3017_vm6, %v2000_v63  ;;  %v302_v61 = vrot.slane %v301_v16, 1  ;;  %vm379_vm6 = vcmask 1040384  }
  0xe6   :  { %1055 = vmatprep.subr.bf16.mxu0 %v1998_v40 }
  0xe7   :  { %v303_v62 = vadd.f32 %v302_v61, %v301_v16 }
  0xe9   :  { %1903 = vmatpush1.bf16.msk.msra.mxu0 %vm3034_vm10, %v2000_v63  ;;  %1957 = vlog2.f32 %v303_v62  ;;  %v352_v63 = vrot.slane %v351_v38, 1 }
  0xea   :  { %1057 = vmatprep.subr.bf16.mxu0 %v1998_v40 }
  0xeb   :  { %v353_v53 = vadd.f32 %v352_v63, %v351_v38 }
  0xed   :  { %1058 = vmatpush1.bf16.msra.mxu0 %v945_v36 }
  0xef   :  { %v1956_v31 = vpop.eup %1955 }
  0xf0   :  { %v316_v25 = vmul.f32 0.6931472, %v1956_v31  ;;  %1907 = vmatmul.mubr.msk.bf16.vlgmr.msra.gmra.mrb[4].mxu0 %vm3054_vm5, %v3064_v60  ;;  %v1971_v60 = vld [vmem:[%s3324_s2] sm:$0x77]  ;;  %s2003_s2 = smov 56  }
  0xf1   :  { %vm1075_vm10 = vcmp.lt.s32.totalorder %v1971_v60, 0 }
  0xf2   :  { %v318_v33 = vadd.f32 %v316_v25, %v3077_v44  ;;  %vm1076_vm5 = vmand %vm1074_vm12, %vm1075_vm10 }
  0xf3   :  { %v1958_v28 = vpop.eup %1957  ;;  %v1099_v14 = vpop.permute.xlu0 %1098 }
  0xf4   :  { %v365_v37 = vsub.f32 %v318_v33, %v362_v34  ;;  %v314_v48 = vmul.f32 0.6931472, %v1958_v28 }
  0xf6   :  { %v378_v43 = vmul.f32 %v374_v41, %v365_v37  ;;  %v317_v50 = vadd.f32 %v314_v48, %v3098_v17  ;;  %v3188_v17 = vsel %vm1076_vm5, 1, %v1998_v40  ;;  %vm3465_vm5 = vmmov %vm3456_vm11 }
  0xf7   :  { %v1081_v10 = vrot.slane %v3188_v17, %v2138_v35  ;;  %v1085_v11 = vrot.slane %v3188_v17, %v2151_v39 }
  0xf8   :  { %v364_v44 = vsub.f32 %v317_v50, %v353_v53  ;;  %v382_v55 = vsel %vm381_vm13, %v378_v43, 0.0 }
  0xf9   :  { %v1089_v45 = vrot.slane %v1081_v10, %v2138_v35  ;;  %v1093_v8 = vrot.slane %v1085_v11, %v2138_v35 }
  0xfa   :  { %v377_v42 = vmul.f32 %v370_v47, %v364_v44 }
  0xfb   :  { %vm1094_vm15 = vcmp.eq.s32.totalorder %v1089_v45, 1  ;;  %vm1095_vm0 = vcmp.eq.s32.totalorder %v1093_v8, 1 }
  0xfc   :  { %v380_v56 = vsel %vm379_vm6, %v377_v42, 0.0  ;;  %v2005_v42 = vmov 286326784  }
  0xfd   :  { %v3174_v2 = vadd.f32 %v382_v55, %v380_v56  ;;  %v1136_v56 = vunpack.c.l.s4 %v2005_v42 }
  0xff   :  { %v1137_v11 = vunpack.c.0.s8 %v1136_v56 }
 0x101   :  { %v1140_v45 = vsub.s32 %v1137_v11, %v2038_v1 }
 0x10f   :  { %v1104_v49 = vpop.permute.xlu1 %1103 }
 0x18f   :  { %v981_v20 = vpop.f32.mrb[0].mxu0 }
 0x190   :  { %v1106_v51 = vsel %vm1094_vm15, %v1099_v14, %v981_v20  ;;  %v983_v40 = vpop.f32.mrb[1].mxu0 }
 0x191   :  { %v1024_v24 = vpop.f32.mrb[0].mxu1  ;;  %v1107_v7 = vsel %vm1095_vm0, %v1099_v14, %v983_v40  ;;  %v985_v12 = vpop.f32.mrb[2].mxu0  ;;  %v1110_v18 = vsub.f32 %v3066_v9, %v1106_v51  ;;  %v1141_v14 = vrot.slane %v2640_v46, %v1140_v45  ;;  %v1243_v45 = vrot.slane %v3188_v17, %v2055_v6 }
 0x192   :  { %1270 = vrot.lane.b32.xlu0 %v1024_v24, %s2003_s2  ;;  %v1026_v52 = vpop.f32.mrb[1].mxu1  ;;  %v1111_v21 = vsub.f32 %v2967_v15, %v1107_v7  ;;  %v1108_v22 = vsel %vm1094_vm15, %v1104_v49, %v985_v12  ;;  %v987_v16 = vpop.f32.mrb[3].mxu0  ;;  %vm3466_vm15 = vmmov %vm3461_vm2 }
 0x193   :  { %v1028_v13 = vpop.f32.mrb[2].mxu1  ;;  %v1112_v26 = vsub.f32 %v3062_v59, %v1108_v22  ;;  %v1109_v61 = vsel %vm1095_vm0, %v1104_v49, %v987_v16  ;;  %1274 = vrot.lane.b32.xlu1 %v987_v16, %s2003_s2  ;;  %v1114_v31 = vmul.f32 %v1110_v18, %v1110_v18  ;;  %vm1142_vm3 = vcmp.eq.s32.totalorder %v3179_v58, %v1141_v14 }
 0x194   :  { %v1030_v27 = vpop.f32.mrb[3].mxu1  ;;  %v1115_v19 = vmul.f32 %v1111_v21, %v1111_v21  ;;  %v1113_v62 = vsub.f32 %v3040_v29, %v1109_v61  ;;  %v3217_v21 = vsel %vm1142_vm3, 1.0, %v2002_v23  ;;  %v1239_v14 = vrot.slane %v3188_v17, %v2049_v4 }
 0x195   :  { %v1116_v30 = vmul.f32 %v1112_v26, %v1112_v26  ;;  %v3220_v16 = vsub.f32 1.0, %v3217_v21 }
 0x196   :  { %1272 = vrot.lane.b32.xlu0 %v1026_v52, %s2003_s2  ;;  %v1117_v54 = vmul.f32 %v1113_v62, %v1113_v62  ;;  %v1126_v25 = vsel %vm3456_vm11, %v1115_v19, 0.0 }
 0x197   :  { %v1118_v57 = vsel %vm264_vm9, %v1116_v30, 0.0  ;;  %1278 = vrot.lane.b32.xlu1 %v1030_v27, %s2003_s2 }
 0x198   :  { %v1119_v32 = vadd.f32 %v1118_v57, %v1114_v31  ;;  %v1127_v41 = vsel %vm3461_vm2, %v1117_v54, 0.0 }
 0x199   :  { %v1128_v33 = vadd.f32 %v1127_v41, %v1126_v25 }
 0x19a   :  { %1268 = vrot.lane.b32.xlu0 %v983_v40, %s2003_s2  ;;  %v1120_v34 = vrot.slane %v1119_v32, 4 }
 0x19b   :  { %v1129_v36 = vrot.slane %v1128_v33, 4  ;;  %1439 = vrot.lane.b32.xlu1 %v1030_v27, %s2004_s3 }
 0x19c   :  { %v1121_v37 = vadd.f32 %v1120_v34, %v1119_v32  ;;  %v3230_v32 = vsel %vm1074_vm12, 1.0, %v2002_v23 }
 0x19d   :  { %v1130_v38 = vadd.f32 %v1129_v36, %v1128_v33  ;;  %v1214_v41 = vrot.slane %v3230_v32, %v2138_v35  ;;  %v1218_v33 = vrot.slane %v3230_v32, %v2151_v39  ;;  %v1385_v23 = vrot.slane %v3230_v32, %v2049_v4 }
 0x19e   :  { %1276 = vrot.lane.b32.xlu0 %v1028_v13, %s2003_s2  ;;  %v1122_v43 = vrot.slane %v1121_v37, 2  ;;  %v1389_v58 = vrot.slane %v3230_v32, %v2055_v6 }
 0x19f   :  { %v1131_v63 = vrot.slane %v1130_v38, 2  ;;  %1435 = vrot.lane.b32.xlu1 %v1026_v52, %s2004_s3  ;;  %v1221_v34 = vsel %vm379_vm6, %v1214_v41, 0.0  ;;  %v1222_v36 = vsel %vm381_vm13, %v1218_v33, 0.0 }
 0x1a0   :  { %v1123_v28 = vadd.f32 %v1122_v43, %v1121_v37  ;;  %v1223_v43 = vadd.f32 %v1222_v36, %v1221_v34 }
 0x1a1   :  { %v1132_v48 = vadd.f32 %v1131_v63, %v1130_v38 }
 0x1a2   :  { %v1124_v47 = vrot.slane %v1123_v28, 1 }
 0x1a3   :  { %v1133_v50 = vrot.slane %v1132_v48, 1 }
 0x1a4   :  { %v1125_v53 = vadd.f32 %v1124_v47, %v1123_v28  ;;  %v1392_v47 = vsel %vm379_vm6, %v1385_v23, 0.0 }
 0x1a5   :  { %v1134_v44 = vadd.f32 %v1133_v50, %v1132_v48  ;;  %v1256_v48 = vpop.permute.xlu0 %1255  ;;  %v1393_v50 = vsel %vm381_vm13, %v1389_v58, 0.0 }
 0x1a6   :  { %v1145_v55 = vadd.f32 1e-09, %v1125_v53 }
 0x1a7   :  { %v1146_v60 = vadd.f32 1e-09, %v1134_v44  ;;  %v1167_v10 = vcombine.low %v1125_v53, %v1134_v44  ;;  %v1394_v44 = vadd.f32 %v1393_v50, %v1392_v47 }
 0x1a8   :  { %1959 = vrsqrt.f32 %v1145_v55  ;;  %vm1149_vm7 = vcmp.eq.f32.partialorder %v1145_v55, inf  ;;  %v1152_v24 = vand.u32 2147483648, %v1145_v55  ;;  %vm1151_vm4 = vcmp.eq.f32.partialorder %v1145_v55, 0.0 }
 0x1a9   :  { %1961 = vrsqrt.f32 %v1146_v60  ;;  %vm1156_vm14 = vcmp.eq.f32.partialorder %v1146_v60, inf  ;;  %v1159_v52 = vand.u32 2147483648, %v1146_v60  ;;  %vm1158_vm8 = vcmp.eq.f32.partialorder %v1146_v60, 0.0 }
 0x1aa   :  { %v1169_v61 = vmul.f32 %v3217_v21, %v1167_v10 }
 0x1b2   :  { %v1960_v8 = vpop.eup %1959 }
 0x1b3   :  { %v1962_v49 = vpop.eup %1961  ;;  %v1148_v20 = vmul.f32 %v1960_v8, %v1145_v55 }
 0x1b4   :  { %v1155_v51 = vmul.f32 %v1962_v49, %v1146_v60  ;;  %v1251_v49 = vrot.slane %v1243_v45, %v2049_v4 }
 0x1b5   :  { %v1150_v40 = vsel %vm1149_vm7, %v1145_v55, %v1148_v20  ;;  %v1260_v55 = vpop.permute.xlu0 %1259 }
 0x1b6   :  { %v1153_v7 = vsel %vm1151_vm4, %v1152_v24, %v1150_v40  ;;  %v1157_v12 = vsel %vm1156_vm14, %v1146_v60, %v1155_v51  ;;  %v1247_v24 = vrot.slane %v1239_v14, %v2049_v4  ;;  %vm1253_vm12 = vcmp.eq.s32.totalorder %v1251_v49, 1 }
 0x1b7   :  { %v1160_v13 = vsel %vm1158_vm8, %v1159_v52, %v1157_v12  ;;  %v1161_v18 = vsub.f32 1.0, %v1153_v7  ;;  %vm1443_vm14 = vcmask 916480   ;;  %vm3467_vm8 = vmmov %vm3466_vm15 }
 0x1b8   :  { %v1162_v1 = vsub.f32 1.0, %v1160_v13  ;;  %vm1252_vm10 = vcmp.eq.s32.totalorder %v1247_v24, 1 }
 0x1b9   :  { %v1163_v46 = vmax.f32 %v1161_v18, 0.0  ;;  %v3255_v10 = vpop.permute.xlu0 %1426 }
 0x1ba   :  { %v1164_v22 = vmax.f32 %v1162_v1, 0.0 }
 0x1bc   :  { %v1173_v27 = vcombine.low %v1163_v46, %v1164_v22 }
 0x1bd   :  { %v3257_v11 = vpop.permute.xlu0 %1430 }
 0x1be   :  { %v1175_v26 = vmul.f32 %v1173_v27, %v3220_v16 }
 0x1c0   :  { %v1176_v19 = vmul.f32 %v1175_v26, %v1173_v27 }
 0x1c2   :  { %v1177_v62 = vadd.f32 %v1176_v19, %v1169_v61 }
 0x1c3   :  { %v1067_v30 = vpop.f32.mrb[4].mxu0  ;;  %384 = vadd.xlane.f32.xlu1 %v3174_v2 }
 0x1c4   :  { %v1069_v31 = vpop.f32.mrb[5].mxu0  ;;  %v1178_v25 = vmul.f32 0.5, %v1177_v62 }
 0x1c5   :  { %v1070_v54 = vpop.f32.mrb[6].mxu0 }
 0x1c6   :  { %1441 = vrot.lane.b32.xlu0 %v1070_v54, %s2004_s3  ;;  %v1072_v57 = vpop.f32.mrb[7].mxu0  ;;  %v1182_v2 = vmul.f32 %v3230_v32, %v1178_v25 }
 0x1c8   :  { %v1187_v37 = vrot.slane %v1182_v2, %v2138_v35  ;;  %v1191_v38 = vrot.slane %v1182_v2, %v2151_v39  ;;  %v1546_v35 = vrot.slane %v3230_v32, %v2046_v3  ;;  %v1550_v39 = vrot.slane %v3230_v32, %v2052_v5 }
 0x1ca   :  { %1437 = vrot.lane.b32.xlu0 %v1067_v30, %s2004_s3  ;;  %v1194_v63 = vsel %vm379_vm6, %v1187_v37, 0.0  ;;  %v1195_v28 = vsel %vm381_vm13, %v1191_v38, 0.0  ;;  %v1553_v42 = vsel %vm379_vm6, %v1546_v35, 0.0  ;;  %v1554_v56 = vsel %vm381_vm13, %v1550_v39, 0.0 }
 0x1cb   :  { %v1196_v53 = vadd.f32 %v1195_v28, %v1194_v63  ;;  %v1555_v60 = vadd.f32 %v1554_v56, %v1553_v42  ;;  %v1410_v42 = vrot.slane %v3188_v17, %v2046_v3  ;;  %v1414_v56 = vrot.slane %v3188_v17, %v2052_v5 }
 0x1cd   :  { %v1418_v45 = vrot.slane %v1410_v42, %v2046_v3  ;;  %v1422_v14 = vrot.slane %v1414_v56, %v2046_v3 }
 0x1cf   :  { %vm1424_vm4 = vcmp.eq.s32.totalorder %v1422_v14, 1  ;;  %vm1423_vm3 = vcmp.eq.s32.totalorder %v1418_v45, 1 }
 0x1e9   :  { %1224 = vadd.xlane.f32.xlu0 %v1223_v43 }
 0x1ed   :  { %1197 = vadd.xlane.f32.xlu0 %v1196_v53 }
 0x1f1   :  { %1395 = vadd.xlane.f32.xlu0 %v1394_v44 }
 0x1f5   :  { %1556 = vadd.xlane.f32.xlu0 %v1555_v60 }
 0x204   :  { %v1271_v8 = vpop.permute.xlu0 %1270 }
 0x205   :  { %v1275_v40 = vpop.permute.xlu1 %1274 }
 0x208   :  { %v1273_v20 = vpop.permute.xlu0 %1272 }
 0x209   :  { %v1282_v51 = vsel %vm1280_vm1, %v1271_v8, %v1273_v20  ;;  %v1279_v1 = vpop.permute.xlu1 %1278 }
 0x20a   :  { %v1290_v52 = vsel %vm1253_vm12, %v1256_v48, %v1282_v51 }
 0x20b   :  { %v1294_v13 = vsub.f32 %v2967_v15, %v1290_v52 }
 0x20c   :  { %v1269_v7 = vpop.permute.xlu0 %1268 }
 0x20d   :  { %v1281_v12 = vsel %vm1280_vm1, %v1269_v7, %v1271_v8  ;;  %v1298_v62 = vmul.f32 %v1294_v13, %v1294_v13  ;;  %v1440_v17 = vpop.permute.xlu1 %1439 }
 0x20e   :  { %v1289_v18 = vsel %vm1252_vm10, %v1256_v48, %v1281_v12 }
 0x20f   :  { %v1293_v26 = vsub.f32 %v3066_v9, %v1289_v18  ;;  %v1309_v41 = vsel %vm3465_vm5, %v1298_v62, 0.0 }
 0x210   :  { %v1277_v46 = vpop.permute.xlu0 %1276 }
 0x211   :  { %v1283_v22 = vsel %vm1280_vm1, %v1275_v40, %v1277_v46  ;;  %v1284_v27 = vsel %vm1280_vm1, %v1277_v46, %v1279_v1  ;;  %v1297_v25 = vmul.f32 %v1293_v26, %v1293_v26  ;;  %vm3468_vm1 = vmmov %vm3465_vm5 }
 0x212   :  { %v1291_v61 = vsel %vm1252_vm10, %v1260_v55, %v1283_v22  ;;  %v1292_v19 = vsel %vm1253_vm12, %v1260_v55, %v1284_v27 }
 0x213   :  { %v1295_v30 = vsub.f32 %v3062_v59, %v1291_v61  ;;  %v1296_v31 = vsub.f32 %v3040_v29, %v1292_v19 }
 0x215   :  { %v1299_v54 = vmul.f32 %v1295_v30, %v1295_v30  ;;  %v1300_v57 = vmul.f32 %v1296_v31, %v1296_v31  ;;  %v1436_v31 = vpop.permute.xlu1 %1435 }
 0x217   :  { %v1301_v33 = vsel %vm264_vm9, %v1299_v54, 0.0  ;;  %v1310_v2 = vsel %vm3466_vm15, %v1300_v57, 0.0 }
 0x218   :  { %v1302_v34 = vadd.f32 %v1301_v33, %v1297_v25  ;;  %v1311_v36 = vadd.f32 %v1310_v2, %v1309_v41 }
 0x21a   :  { %v1303_v37 = vrot.slane %v1302_v34, 4  ;;  %v1312_v38 = vrot.slane %v1311_v36, 4 }
 0x21c   :  { %v1304_v43 = vadd.f32 %v1303_v37, %v1302_v34  ;;  %v1313_v23 = vadd.f32 %v1312_v38, %v1311_v36 }
 0x21e   :  { %v1305_v58 = vrot.slane %v1304_v43, 2  ;;  %v1314_v63 = vrot.slane %v1313_v23, 2 }
 0x220   :  { %v1306_v28 = vadd.f32 %v1305_v58, %v1304_v43  ;;  %v1315_v48 = vadd.f32 %v1314_v63, %v1313_v23 }
 0x222   :  { %v1307_v47 = vrot.slane %v1306_v28, 1  ;;  %v1316_v50 = vrot.slane %v1315_v48, 1 }
 0x224   :  { %v1308_v35 = vadd.f32 %v1307_v47, %v1306_v28  ;;  %v1317_v39 = vadd.f32 %v1316_v50, %v1315_v48 }
 0x226   :  { %v1318_v53 = vadd.f32 1e-09, %v1308_v35  ;;  %v1319_v44 = vadd.f32 1e-09, %v1317_v39  ;;  %v1340_v22 = vcombine.low %v1308_v35, %v1317_v39 }
 0x228   :  { %1963 = vrsqrt.f32 %v1318_v53  ;;  %vm1322_vm0 = vcmp.eq.f32.partialorder %v1318_v53, inf  ;;  %v1325_v49 = vand.u32 2147483648, %v1318_v53  ;;  %vm1324_vm11 = vcmp.eq.f32.partialorder %v1318_v53, 0.0 }
 0x229   :  { %1965 = vrsqrt.f32 %v1319_v44  ;;  %vm1329_vm2 = vcmp.eq.f32.partialorder %v1319_v44, inf  ;;  %v1332_v51 = vand.u32 2147483648, %v1319_v44  ;;  %vm1331_vm7 = vcmp.eq.f32.partialorder %v1319_v44, 0.0 }
 0x22a   :  { %v1341_v57 = vrot.slane %v1340_v22, 7 }
 0x22c   :  { %v1343_v38 = vmul.f32 %v3217_v21, %v1341_v57 }
 0x232   :  { %v1964_v55 = vpop.eup %1963 }
 0x233   :  { %v1966_v60 = vpop.eup %1965  ;;  %v1321_v8 = vmul.f32 %v1964_v55, %v1318_v53 }
 0x234   :  { %v1328_v20 = vmul.f32 %v1966_v60, %v1319_v44 }
 0x235   :  { %v1323_v24 = vsel %vm1322_vm0, %v1318_v53, %v1321_v8 }
 0x236   :  { %v1326_v40 = vsel %vm1324_vm11, %v1325_v49, %v1323_v24  ;;  %v1330_v52 = vsel %vm1329_vm2, %v1319_v44, %v1328_v20 }
 0x237   :  { %v1333_v7 = vsel %vm1331_vm7, %v1332_v51, %v1330_v52  ;;  %v1334_v12 = vsub.f32 1.0, %v1326_v40 }
 0x238   :  { %v1335_v13 = vsub.f32 1.0, %v1333_v7  ;;  %v1442_v1 = vpop.permute.xlu0 %1441 }
 0x239   :  { %v1336_v18 = vmax.f32 %v1334_v12, 0.0  ;;  %v1445_v27 = vsel %vm1443_vm14, %v1440_v17, %v1442_v1  ;;  %v1453_v26 = vsel %vm1424_vm4, %v3257_v11, %v1442_v1 }
 0x23a   :  { %v1337_v46 = vmax.f32 %v1335_v13, 0.0  ;;  %v1452_v61 = vsel %vm1423_vm3, %v3257_v11, %v1445_v27  ;;  %v1457_v19 = vsub.f32 %v3040_v29, %v1453_v26 }
 0x23b   :  { %v1456_v30 = vsub.f32 %v3062_v59, %v1452_v61 }
 0x23c   :  { %v1346_v62 = vcombine.low %v1336_v18, %v1337_v46  ;;  %v1438_v54 = vpop.permute.xlu0 %1437  ;;  %v1461_v41 = vmul.f32 %v1457_v19, %v1457_v19 }
 0x23d   :  { %v1444_v33 = vsel %vm1443_vm14, %v1436_v31, %v1438_v54  ;;  %v1451_v2 = vsel %vm1424_vm4, %v3255_v10, %v1438_v54  ;;  %v1460_v34 = vmul.f32 %v1456_v30, %v1456_v30  ;;  %vm1601_vm4 = vcmask 49152  }
 0x23e   :  { %v1347_v25 = vrot.slane %v1346_v62, 7  ;;  %v1450_v36 = vsel %vm1423_vm3, %v3255_v10, %v1444_v33  ;;  %v1455_v11 = vsub.f32 %v2967_v15, %v1451_v2  ;;  %v1471_v63 = vsel %vm3467_vm8, %v1461_v41, 0.0 }
 0x23f   :  { %v1454_v59 = vsub.f32 %v3066_v9, %v1450_v36  ;;  %v1462_v58 = vsel %vm264_vm9, %v1460_v34, 0.0 }
 0x240   :  { %v1349_v29 = vmul.f32 %v1347_v25, %v3220_v16  ;;  %v1459_v37 = vmul.f32 %v1455_v11, %v1455_v11 }
 0x241   :  { %v1458_v23 = vmul.f32 %v1454_v59, %v1454_v59 }
 0x242   :  { %v1350_v43 = vmul.f32 %v1349_v29, %v1347_v25  ;;  %v1470_v28 = vsel %vm3468_vm1, %v1459_v37, 0.0 }
 0x243   :  { %v1463_v47 = vadd.f32 %v1462_v58, %v1458_v23  ;;  %v1472_v10 = vadd.f32 %v1471_v63, %v1470_v28 }
 0x244   :  { %v1351_v48 = vadd.f32 %v1350_v43, %v1343_v38 }
 0x245   :  { %v1464_v15 = vrot.slane %v1463_v47, 4  ;;  %v1473_v35 = vrot.slane %v1472_v10, 4 }
 0x246   :  { %v1352_v50 = vmul.f32 0.5, %v1351_v48 }
 0x247   :  { %v1465_v9 = vadd.f32 %v1464_v15, %v1463_v47  ;;  %v1474_v53 = vadd.f32 %v1473_v35, %v1472_v10 }
 0x248   :  { %v1354_v39 = vmul.f32 %v3230_v32, %v1352_v50 }
 0x249   :  { %v1466_v56 = vrot.slane %v1465_v9, 2  ;;  %v1475_v55 = vrot.slane %v1474_v53, 2 }
 0x24a   :  { %v1359_v44 = vrot.slane %v1354_v39, %v2049_v4  ;;  %v1363_v42 = vrot.slane %v1354_v39, %v2055_v6 }
 0x24b   :  { %v1467_v8 = vadd.f32 %v1466_v56, %v1465_v9  ;;  %v1476_v14 = vadd.f32 %v1475_v55, %v1474_v53 }
 0x24c   :  { %v1366_v60 = vsel %vm379_vm6, %v1359_v44, 0.0  ;;  %v1367_v45 = vsel %vm381_vm13, %v1363_v42, 0.0 }
 0x24d   :  { %v1368_v49 = vadd.f32 %v1367_v45, %v1366_v60  ;;  %v1468_v20 = vrot.slane %v1467_v8, 1  ;;  %v1477_v24 = vrot.slane %v1476_v14, 1 }
 0x24f   :  { %1369 = vadd.xlane.f32.xlu1 %v1368_v49  ;;  %v1469_v51 = vadd.f32 %v1468_v20, %v1467_v8  ;;  %v1478_v40 = vadd.f32 %v1477_v24, %v1476_v14 }
 0x250   :  { %v385_v52 = vpop.xlane.xlu1 %384 }
 0x251   :  { %v1479_v7 = vadd.f32 1e-09, %v1469_v51  ;;  %v1480_v12 = vadd.f32 1e-09, %v1478_v40  ;;  %v386_v4 = vrot.slane %v385_v52, 4  ;;  %v1501_v2 = vcombine.low %v1469_v51, %v1478_v40 }
 0x253   :  { %1967 = vrsqrt.f32 %v1479_v7  ;;  %v387_v6 = vadd.f32 %v386_v4, %v385_v52  ;;  %vm1483_vm9 = vcmp.eq.f32.partialorder %v1479_v7, inf  ;;  %v1486_v26 = vand.u32 2147483648, %v1479_v7 }
 0x254   :  { %1969 = vrsqrt.f32 %v1480_v12  ;;  %vm1485_vm12 = vcmp.eq.f32.partialorder %v1479_v7, 0.0  ;;  %vm1490_vm10 = vcmp.eq.f32.partialorder %v1480_v12, inf  ;;  %v1493_v62 = vand.u32 2147483648, %v1480_v12 }
 0x255   :  { %v388_v17 = vrot.slane %v387_v6, 2  ;;  %vm1492_vm5 = vcmp.eq.f32.partialorder %v1480_v12, 0.0  ;;  %v1502_v36 = vrot.slane %v1501_v2, 6 }
 0x257   :  { %v389_v13 = vadd.f32 %v388_v17, %v387_v6  ;;  %v1504_v59 = vmul.f32 %v3217_v21, %v1502_v36 }
 0x259   :  { %v390_v18 = vrot.slane %v389_v13, 1 }
 0x25b   :  { %v391_v1 = vadd.f32 %v390_v18, %v389_v13 }
 0x25d   :  { %v1968_v46 = vpop.eup %1967  ;;  %1918 = vpush %v391_v1 }
 0x25e   :  { %v1970_v22 = vpop.eup %1969  ;;  %v1482_v27 = vmul.f32 %v1968_v46, %v1479_v7 }
 0x25f   :  { %v1489_v61 = vmul.f32 %v1970_v22, %v1480_v12 }
 0x260   :  { %v1484_v19 = vsel %vm1483_vm9, %v1479_v7, %v1482_v27 }
 0x261   :  { %v1487_v30 = vsel %vm1485_vm12, %v1486_v26, %v1484_v19  ;;  %v1491_v31 = vsel %vm1490_vm10, %v1480_v12, %v1489_v61 }
 0x262   :  { %v1494_v54 = vsel %vm1492_vm5, %v1493_v62, %v1491_v31  ;;  %v1495_v57 = vsub.f32 1.0, %v1487_v30  ;;  %v1572_v31 = vand.u32 127, %v249_v0 }
 0x263   :  { %v1496_v25 = vsub.f32 1.0, %v1494_v54 }
 0x264   :  { %v1497_v41 = vmax.f32 %v1495_v57, 0.0  ;;  %vm1581_vm15 = vcmp.eq.s32.totalorder %v1572_v31, 4  ;;  %vm1585_vm0 = vcmp.eq.s32.totalorder %v1572_v31, 2  ;;  %vm1589_vm11 = vcmp.eq.s32.totalorder %v1572_v31, 5 }
 0x265   :  { %v1498_v33 = vmax.f32 %v1496_v25, 0.0  ;;  %vm1593_vm2 = vcmp.eq.s32.totalorder %v1572_v31, 3  ;;  %vm1597_vm7 = vcmp.eq.s32.totalorder %v1572_v31, 6 }
 0x267   :  { %v1507_v34 = vcombine.low %v1497_v41, %v1498_v33 }
 0x269   :  { %v1508_v11 = vrot.slane %v1507_v34, 6 }
 0x26b   :  { %v1510_v29 = vmul.f32 %v1508_v11, %v3220_v16 }
 0x26d   :  { %v1511_v37 = vmul.f32 %v1510_v29, %v1508_v11 }
 0x26f   :  { %v1512_v38 = vadd.f32 %v1511_v37, %v1504_v59 }
 0x271   :  { %v1513_v43 = vmul.f32 0.5, %v1512_v38 }
 0x273   :  { %v1515_v23 = vmul.f32 %v3230_v32, %v1513_v43 }
 0x275   :  { %v1520_v58 = vrot.slane %v1515_v23, %v2046_v3  ;;  %v1524_v63 = vrot.slane %v1515_v23, %v2052_v5 }
 0x276   :  { %v1225_v28 = vpop.xlane.xlu0 %1224 }
 0x277   :  { %v1226_v48 = vrot.slane %v1225_v28, 4  ;;  %v1527_v47 = vsel %vm379_vm6, %v1520_v58, 0.0  ;;  %v1528_v10 = vsel %vm381_vm13, %v1524_v63, 0.0  ;;  %vm1573_vm6 = vcmp.eq.s32.totalorder %v1572_v31, 0 }
 0x278   :  { %v1529_v50 = vadd.f32 %v1528_v10, %v1527_v47  ;;  %vm1577_vm13 = vcmp.eq.s32.totalorder %v1572_v31, 1 }
 0x279   :  { %v1227_v15 = vadd.f32 %v1226_v48, %v1225_v28 }
 0x27a   :  { %1530 = vadd.xlane.f32.xlu1 %v1529_v50  ;;  %v1198_v16 = vpop.xlane.xlu0 %1197 }
 0x27b   :  { %v1228_v21 = vrot.slane %v1227_v15, 2  ;;  %v1199_v35 = vrot.slane %v1198_v16, 4 }
 0x27d   :  { %v1200_v39 = vadd.f32 %v1199_v35, %v1198_v16  ;;  %v1229_v9 = vadd.f32 %v1228_v21, %v1227_v15 }
 0x27e   :  { %v1396_v56 = vpop.xlane.xlu0 %1395 }
 0x27f   :  { %v1201_v53 = vrot.slane %v1200_v39, 2  ;;  %v1230_v32 = vrot.slane %v1229_v9, 1  ;;  %v1397_v55 = vrot.slane %v1396_v56, 4 }
 0x281   :  { %v1202_v44 = vadd.f32 %v1201_v53, %v1200_v39  ;;  %v1231_v42 = vadd.f32 %v1230_v32, %v1229_v9  ;;  %v1398_v60 = vadd.f32 %v1397_v55, %v1396_v56 }
 0x282   :  { %v1557_v4 = vpop.xlane.xlu0 %1556 }
 0x283   :  { %v1203_v3 = vrot.slane %v1202_v44, 1  ;;  %v1399_v45 = vrot.slane %v1398_v60, 2  ;;  %v1558_v6 = vrot.slane %v1557_v4, 4 }
 0x285   :  { %v1204_v5 = vadd.f32 %v1203_v3, %v1202_v44  ;;  %v1400_v49 = vadd.f32 %v1399_v45, %v1398_v60  ;;  %v1559_v17 = vadd.f32 %v1558_v6, %v1557_v4 }
 0x287   :  { %1920 = vpush %v1204_v5  ;;  %v1401_v51 = vrot.slane %v1400_v49, 1  ;;  %v1560_v13 = vrot.slane %v1559_v17, 2 }
 0x288   :  { %1922 = vpush %v1231_v42 }
 0x289   :  { %v1402_v7 = vadd.f32 %v1401_v51, %v1400_v49  ;;  %v1561_v22 = vadd.f32 %v1560_v13, %v1559_v17 }
 0x28b   :  { %v1562_v61 = vrot.slane %v1561_v22, 1 }
 0x28d   :  { %v1563_v30 = vadd.f32 %v1562_v61, %v1561_v22 }
 0x28e   :  { %s1919_s29 = spop %1918 }
 0x28f   :  { %v1575_v54 = vstv %s1919_s29 }
 0x290   :  { %v1576_v25 = vsel %vm1573_vm6, %v1575_v54, 0.0 }
 0x2b8   :  { %s1921_s30 = spop %1920 }
 0x2b9   :  { %v1579_v57 = vstv %s1921_s30  ;;  %s1923_s6 = spop %1922 }
 0x2ba   :  { %v1580_v41 = vsel %vm1577_vm13, %v1579_v57, %v1576_v25  ;;  %v1583_v33 = vstv %s1923_s6 }
 0x2bb   :  { %v1584_v34 = vsel %vm1581_vm15, %v1583_v33, %v1580_v41 }
 0x2dc   :  { %v1370_v8 = vpop.xlane.xlu1 %1369 }
 0x2dd   :  { %v1371_v14 = vrot.slane %v1370_v8, 4 }
 0x2df   :  { %v1372_v20 = vadd.f32 %v1371_v14, %v1370_v8 }
 0x2e1   :  { %v1373_v24 = vrot.slane %v1372_v20, 2 }
 0x2e3   :  { %v1374_v40 = vadd.f32 %v1373_v24, %v1372_v20 }
 0x2e5   :  { %v1375_v52 = vrot.slane %v1374_v40, 1 }
 0x2e7   :  { %v1376_v12 = vadd.f32 %v1375_v52, %v1374_v40 }
 0x2e9   :  { %1924 = vpush %v1376_v12 }
 0x2ea   :  { %1926 = vpush %v1402_v7 }
 0x307   :  { %v1531_v18 = vpop.xlane.xlu1 %1530 }
 0x308   :  { %v1532_v1 = vrot.slane %v1531_v18, 4 }
 0x30a   :  { %v1533_v46 = vadd.f32 %v1532_v1, %v1531_v18 }
 0x30c   :  { %v1534_v27 = vrot.slane %v1533_v46, 2 }
 0x30e   :  { %v1535_v26 = vadd.f32 %v1534_v27, %v1533_v46 }
 0x310   :  { %v1536_v19 = vrot.slane %v1535_v26, 1 }
 0x312   :  { %v1537_v62 = vadd.f32 %v1536_v19, %v1535_v26 }
 0x314   :  { %1928 = vpush %v1537_v62 }
 0x315   :  { %1930 = vpush %v1563_v30 }
 0x31a   :  { %s1925_s7 = spop %1924 }
 0x31b   :  { %v1587_v2 = vstv %s1925_s7  ;;  %s1927_s8 = spop %1926 }
 0x31c   :  { %v1588_v36 = vsel %vm1585_vm0, %v1587_v2, %v1584_v34  ;;  %v1591_v11 = vstv %s1927_s8 }
 0x31d   :  { %v1592_v0 = vsel %vm1589_vm11, %v1591_v11, %v1588_v36 }
 0x345   :  { %s1929_s11 = spop %1928 }
 0x346   :  { %v1595_v29 = vstv %s1929_s11  ;;  %s1931_s12 = spop %1930 }
 0x347   :  { %v1596_v59 = vsel %vm1593_vm2, %v1595_v29, %v1592_v0  ;;  %v1599_v37 = vstv %s1931_s12 }
 0x348   :  { %v1600_v38 = vsel %vm1597_vm7, %v1599_v37, %v1596_v59 }
 0x349   :  { %1602 = vst.msk [vmem:[#allocation5] sm:$0x1] %vm1601_vm4, %v1600_v38 }
 0x34a   :  { %1983 = shalt.err (!%p1980_p4)
}
 0x34b   :  { %s1984_s17 = scalar_lea.hbm %s3327_s5, 16 }
 0x34c   :  { %p1985_p5 = scmp.ne.s32.totalorder %s3327_s5, %s1984_s17  ;;  %p1988_p6 = scmp.lt.u32.totalorder %s1984_s17, %s3327_s5 }
 0x34e   :  { %p1990_p7 = pnand %p1988_p6, %p1985_p5 }
 0x350   :  { %1993 = shalt.err (!%p1990_p7)
}
 0x351   :  { %1612 = dma.vmem_to_hbm [thread:$0]  %s1610_s10, 16, %s3327_s5, [#allocation6]  }
 0x352   :  { %1994 = dma.done.wait [#allocation6], 16  }
 0x353   :  { %1995 = vsyncadd [#allocation6], 4294967280 }
 0x354   :  { %1616 = vsyncpa [#allocation6], 1 }

</bundles_post_ra>
